<compile_context>
chip_gen: v7x
topology: tpu7x:2x2x1
jax: 0.10.0
libtpu: 0.0.40
codegen_flags: <defaults>
</compile_context>

<pallas_src>
import math

import jax
import jax.numpy as jnp
from jax.experimental import pallas as pl
from jax.experimental.pallas import tpu as pltpu

DIM_IN = 10                      # Shokri attack MLP input = shadow-model posterior vector
H1, H2, H3, OUT = 512, 128, 32, 2
H3_PAD = 128                     # zero-pad fc3 output / fc4 input to a full lane tile


def _round_up(a, b):
    return -(-a // b) * b


def _attack_mlp_kernel(nrows_ref,                      # scalar prefetch (SMEM): valid row count
                       x_ref,
                       w1_ref, b1_ref,
                       w2_ref, b2_ref,
                       w3_ref, b3_ref,
                       w4_ref, b4_ref,
                       o_ref):
    """Whole MLP for one batch tile; all operands resident in VMEM."""
    tile = x_ref.shape[0]
    i = pl.program_id(0)

    # Zero-fill rows past the true batch size (ragged last tile); this keeps
    # the out-of-bounds rows deterministic / NaN-free. Their outputs are
    # dropped by Pallas' masked store anyway.
    row = jax.lax.broadcasted_iota(jnp.int32, (tile, 1), 0) + i * tile
    valid = row < nrows_ref[0]
    x = jnp.where(valid, x_ref[...], 0.0).astype(jnp.bfloat16)

    # fc1 + relu (bf16 MXU matmul, f32 accumulate)
    h = jnp.dot(x, w1_ref[...], preferred_element_type=jnp.float32) + b1_ref[...]
    h = jnp.maximum(h, 0.0).astype(jnp.bfloat16)
    # fc2 + relu
    h = jnp.dot(h, w2_ref[...], preferred_element_type=jnp.float32) + b2_ref[...]
    h = jnp.maximum(h, 0.0).astype(jnp.bfloat16)
    # fc3 + relu (output padded to 128 lanes; padded columns are exactly 0)
    h = jnp.dot(h, w3_ref[...], preferred_element_type=jnp.float32) + b3_ref[...]
    h = jnp.maximum(h, 0.0).astype(jnp.bfloat16)
    # fc4 -> (tile, 2) logits
    logits = jnp.dot(h, w4_ref[...], preferred_element_type=jnp.float32) + b4_ref[...]

    # 2-class softmax in sigmoid form (no cross-lane reductions):
    #   p1 = 1 / (1 + exp(l0 - l1)),  p0 = 1 - p1
    l0 = logits[:, 0:1]
    l1 = logits[:, 1:2]
    p1 = 1.0 / (1.0 + jnp.exp(l0 - l1))
    p0 = 1.0 - p1

    lane = jax.lax.broadcasted_iota(jnp.int32, (tile, OUT), 1)
    o_ref[...] = jnp.where(lane == 0, p0, p1).astype(o_ref.dtype)


def attack_mlp_forward(x, kparams, *, tile_batch=1024):
    """Run the AttackMLP forward pass via pallas_call.

    x: (..., dim_in) float array -- flattened to (N, dim_in) like x.view(-1, dim_in).
    kparams: output of prepare_kernel_params() (bf16 weights, f32 biases,
             fc3/fc4 padded to H3_PAD).
    tile_batch: rows per grid step (rounded up to a multiple of 256).
    """
    x2 = x.reshape(-1, DIM_IN).astype(jnp.float32)
    n = x2.shape[0]

    # MXU-friendly tile: multiple of 256 (covers 128 for v5e, 256 for v6e/v7x),
    # capped so a single small batch doesn't over-allocate.
    tile = min(_round_up(tile_batch, 256), _round_up(n, 256))
    grid = (pl.cdiv(n, tile),)

    nrows = jnp.array([n], dtype=jnp.int32)   # scalar prefetch -> SMEM

    def batch_map(i, nrows_ref):
        return (i, 0)

    def full_map(i, nrows_ref):
        return (0, 0)

    out = pl.pallas_call(
        _attack_mlp_kernel,
        out_shape=jax.ShapeDtypeStruct((n, OUT), jnp.float32),
        grid_spec=pltpu.PrefetchScalarGridSpec(
            num_scalar_prefetch=1,
            grid=grid,
            in_specs=[
                pl.BlockSpec((tile, DIM_IN), batch_map),      # x tile
                pl.BlockSpec((DIM_IN, H1), full_map),         # w1 (bf16)
                pl.BlockSpec((1, H1), full_map),              # b1 (f32)
                pl.BlockSpec((H1, H2), full_map),             # w2
                pl.BlockSpec((1, H2), full_map),              # b2
                pl.BlockSpec((H2, H3_PAD), full_map),         # w3 (padded)
                pl.BlockSpec((1, H3_PAD), full_map),          # b3 (padded)
                pl.BlockSpec((H3_PAD, OUT), full_map),        # w4 (padded rows)
                pl.BlockSpec((1, OUT), full_map),             # b4
            ],
            out_specs=pl.BlockSpec((tile, OUT), batch_map),
        ),
        compiler_params=pltpu.CompilerParams(
            # Many grid steps -> sharded across both v7x TensorCores.
            dimension_semantics=("parallel",),
        ),
    )(nrows, x2,
      kparams["w1"], kparams["b1"],
      kparams["w2"], kparams["b2"],
      kparams["w3"], kparams["b3"],
      kparams["w4"], kparams["b4"])

    return out


def init_params(key):
    """Deterministic f32 master params mimicking PyTorch nn.Linear default init:
    U(-1/sqrt(fan_in), 1/sqrt(fan_in)) for both weight and bias."""
    dims = [(DIM_IN, H1), (H1, H2), (H2, H3), (H3, OUT)]
    params = {}
    for idx, (fan_in, fan_out) in enumerate(dims, start=1):
        key, kw, kb = jax.random.split(key, 3)
        bound = 1.0 / math.sqrt(fan_in)
        params[f"w{idx}"] = jax.random.uniform(
            kw, (fan_in, fan_out), jnp.float32, minval=-bound, maxval=bound)
        params[f"b{idx}"] = jax.random.uniform(
            kb, (1, fan_out), jnp.float32, minval=-bound, maxval=bound)
    return params


def prepare_kernel_params(params):
    """bf16 weights for the MXU + lane-aligned zero padding of the fc3/fc4 stage."""
    w3p = jnp.zeros((H2, H3_PAD), jnp.float32).at[:, :H3].set(params["w3"])
    b3p = jnp.zeros((1, H3_PAD), jnp.float32).at[:, :H3].set(params["b3"])
    w4p = jnp.zeros((H3_PAD, OUT), jnp.float32).at[:H3, :].set(params["w4"])
    return {
        "w1": params["w1"].astype(jnp.bfloat16), "b1": params["b1"],
        "w2": params["w2"].astype(jnp.bfloat16), "b2": params["b2"],
        "w3": w3p.astype(jnp.bfloat16),          "b3": b3p,
        "w4": w4p.astype(jnp.bfloat16),          "b4": params["b4"],
    }


def reference_forward(x, params):
    """Plain-JAX f32 reference (matches the PyTorch forward semantics)."""
    h = x.reshape(-1, DIM_IN).astype(jnp.float32)
    h = jnp.maximum(h @ params["w1"] + params["b1"], 0.0)
    h = jnp.maximum(h @ params["w2"] + params["b2"], 0.0)
    h = jnp.maximum(h @ params["w3"] + params["b3"], 0.0)
    logits = h @ params["w4"] + params["b4"]
    return jax.nn.softmax(logits, axis=1)


if __name__ == "__main__":
    key = jax.random.PRNGKey(0)
    k_param, k_x = jax.random.split(key)

    params = init_params(k_param)
    kparams = prepare_kernel_params(params)

    # (5, 10, DIM_IN) exercises the x.view(-1, dim_in) flatten and a ragged
    # (N=50, not a multiple of the batch tile) last block.
    x = jax.random.normal(k_x, (5, 10, DIM_IN), dtype=jnp.float32)

    out = attack_mlp_forward(x, kparams)
    out = jax.block_until_ready(out)

    ref = reference_forward(x, params)
    assert out.shape == (50, OUT)
    # rows of a softmax must sum to 1 (sigmoid form keeps this exact to f32 ulp)
    assert jnp.allclose(jnp.sum(out, axis=1), 1.0, atol=1e-5)
    # bf16 matmul inputs vs f32 reference: loose but meaningful tolerance
    err = float(jnp.max(jnp.abs(out - ref)))
    assert err < 2e-2, f"mismatch vs JAX reference: max abs err = {err}"

    print("KERNEL_OK")
</pallas_src>

<mosaic_0001>
module attributes {stable_mosaic.version = 11 : i64} {
  func.func @_attack_mlp_kernel(%arg0: i32, %arg1: memref<1xi32, #tpu.memory_space<smem>>, %arg2: memref<256x10xf32, #tpu.memory_space<vmem>>, %arg3: memref<10x512xbf16, #tpu.memory_space<vmem>>, %arg4: memref<1x512xf32, #tpu.memory_space<vmem>>, %arg5: memref<512x128xbf16, #tpu.memory_space<vmem>>, %arg6: memref<1x128xf32, #tpu.memory_space<vmem>>, %arg7: memref<128x128xbf16, #tpu.memory_space<vmem>>, %arg8: memref<1x128xf32, #tpu.memory_space<vmem>>, %arg9: memref<128x2xbf16, #tpu.memory_space<vmem>>, %arg10: memref<1x2xf32, #tpu.memory_space<vmem>>, %arg11: memref<256x2xf32, #tpu.memory_space<vmem>>) attributes {dimension_semantics = [#tpu.dimension_semantics<parallel>], iteration_bounds = array<i64: 1>, scalar_prefetch = 1 : i64, scratch_operands = 0 : i64, tpu.core_type = #tpu.core_type<tc>, window_params = [{transform_indices = @transform_0, window_bounds = array<i64: 256, 10>}, {pipeline_mode = #tpu.pipeline_mode<synchronous>, transform_indices = @transform_1, window_bounds = array<i64: 10, 512>}, {pipeline_mode = #tpu.pipeline_mode<synchronous>, transform_indices = @transform_2, window_bounds = array<i64: 1, 512>}, {pipeline_mode = #tpu.pipeline_mode<synchronous>, transform_indices = @transform_3, window_bounds = array<i64: 512, 128>}, {pipeline_mode = #tpu.pipeline_mode<synchronous>, transform_indices = @transform_4, window_bounds = array<i64: 1, 128>}, {pipeline_mode = #tpu.pipeline_mode<synchronous>, transform_indices = @transform_5, window_bounds = array<i64: 128, 128>}, {pipeline_mode = #tpu.pipeline_mode<synchronous>, transform_indices = @transform_6, window_bounds = array<i64: 1, 128>}, {pipeline_mode = #tpu.pipeline_mode<synchronous>, transform_indices = @transform_7, window_bounds = array<i64: 128, 2>}, {pipeline_mode = #tpu.pipeline_mode<synchronous>, transform_indices = @transform_8, window_bounds = array<i64: 1, 2>}, {transform_indices = @transform_9, window_bounds = array<i64: 256, 2>}]} {
    %0 = tpu.iota {dimensions = array<i32: 0>} : vector<256x1xi32>
    %c256_i32 = arith.constant 256 : i32
    %1 = arith.muli %arg0, %c256_i32 : i32
    %2 = vector.broadcast %1 : i32 to vector<256x1xi32>
    %3 = arith.addi %0, %2 : vector<256x1xi32>
    %c0 = arith.constant 0 : index
    %4 = memref.load %arg1[%c0] : memref<1xi32, #tpu.memory_space<smem>>
    %5 = vector.broadcast %4 : i32 to vector<256x1xi32>
    %6 = arith.cmpi slt, %3, %5 : vector<256x1xi32>
    %c0_0 = arith.constant 0 : index
    %c0_1 = arith.constant 0 : index
    %7 = vector.load %arg2[%c0_0, %c0_1] : memref<256x10xf32, #tpu.memory_space<vmem>>, vector<256x10xf32>
    %cst = arith.constant 0.000000e+00 : f32
    %8 = vector.shape_cast %6 : vector<256x1xi1> to vector<256x1xi1>
    %9 = vector.broadcast %8 : vector<256x1xi1> to vector<256x10xi1>
    %10 = vector.broadcast %cst : f32 to vector<256x10xf32>
    %11 = arith.select %9, %7, %10 : vector<256x10xi1>, vector<256x10xf32>
    %12 = arith.truncf %11 : vector<256x10xf32> to vector<256x10xbf16>
    %c0_2 = arith.constant 0 : index
    %c0_3 = arith.constant 0 : index
    %13 = vector.load %arg3[%c0_2, %c0_3] : memref<10x512xbf16, #tpu.memory_space<vmem>>, vector<10x512xbf16>
    %cst_4 = arith.constant dense<0.000000e+00> : vector<256x512xf32>
    %14 = tpu.matmul %12, %13, %cst_4 {dimension_numbers = #tpu.dot_dimension_numbers<[1], [0], [0], [1], [0, 0, 1, 1], [], []>} : vector<256x10xbf16>, vector<10x512xbf16>, vector<256x512xf32> -> vector<256x512xf32>
    %c0_5 = arith.constant 0 : index
    %c0_6 = arith.constant 0 : index
    %15 = vector.load %arg4[%c0_5, %c0_6] : memref<1x512xf32, #tpu.memory_space<vmem>>, vector<1x512xf32>
    %16 = vector.broadcast %15 : vector<1x512xf32> to vector<256x512xf32>
    %17 = arith.addf %14, %16 : vector<256x512xf32>
    %cst_7 = arith.constant 0.000000e+00 : f32
    %18 = vector.broadcast %cst_7 : f32 to vector<256x512xf32>
    %19 = arith.maximumf %17, %18 : vector<256x512xf32>
    %20 = arith.truncf %19 : vector<256x512xf32> to vector<256x512xbf16>
    %c0_8 = arith.constant 0 : index
    %c0_9 = arith.constant 0 : index
    %21 = vector.load %arg5[%c0_8, %c0_9] : memref<512x128xbf16, #tpu.memory_space<vmem>>, vector<512x128xbf16>
    %cst_10 = arith.constant dense<0.000000e+00> : vector<256x128xf32>
    %22 = tpu.matmul %20, %21, %cst_10 {dimension_numbers = #tpu.dot_dimension_numbers<[1], [0], [0], [1], [0, 0, 1, 1], [], []>} : vector<256x512xbf16>, vector<512x128xbf16>, vector<256x128xf32> -> vector<256x128xf32>
    %c0_11 = arith.constant 0 : index
    %c0_12 = arith.constant 0 : index
    %23 = vector.load %arg6[%c0_11, %c0_12] : memref<1x128xf32, #tpu.memory_space<vmem>>, vector<1x128xf32>
    %24 = vector.broadcast %23 : vector<1x128xf32> to vector<256x128xf32>
    %25 = arith.addf %22, %24 : vector<256x128xf32>
    %cst_13 = arith.constant 0.000000e+00 : f32
    %26 = vector.broadcast %cst_13 : f32 to vector<256x128xf32>
    %27 = arith.maximumf %25, %26 : vector<256x128xf32>
    %28 = arith.truncf %27 : vector<256x128xf32> to vector<256x128xbf16>
    %c0_14 = arith.constant 0 : index
    %c0_15 = arith.constant 0 : index
    %29 = vector.load %arg7[%c0_14, %c0_15] : memref<128x128xbf16, #tpu.memory_space<vmem>>, vector<128x128xbf16>
    %cst_16 = arith.constant dense<0.000000e+00> : vector<256x128xf32>
    %30 = tpu.matmul %28, %29, %cst_16 {dimension_numbers = #tpu.dot_dimension_numbers<[1], [0], [0], [1], [0, 0, 1, 1], [], []>} : vector<256x128xbf16>, vector<128x128xbf16>, vector<256x128xf32> -> vector<256x128xf32>
    %c0_17 = arith.constant 0 : index
    %c0_18 = arith.constant 0 : index
    %31 = vector.load %arg8[%c0_17, %c0_18] : memref<1x128xf32, #tpu.memory_space<vmem>>, vector<1x128xf32>
    %32 = vector.broadcast %31 : vector<1x128xf32> to vector<256x128xf32>
    %33 = arith.addf %30, %32 : vector<256x128xf32>
    %cst_19 = arith.constant 0.000000e+00 : f32
    %34 = vector.broadcast %cst_19 : f32 to vector<256x128xf32>
    %35 = arith.maximumf %33, %34 : vector<256x128xf32>
    %36 = arith.truncf %35 : vector<256x128xf32> to vector<256x128xbf16>
    %c0_20 = arith.constant 0 : index
    %c0_21 = arith.constant 0 : index
    %37 = vector.load %arg9[%c0_20, %c0_21] : memref<128x2xbf16, #tpu.memory_space<vmem>>, vector<128x2xbf16>
    %cst_22 = arith.constant dense<0.000000e+00> : vector<256x2xf32>
    %38 = tpu.matmul %36, %37, %cst_22 {dimension_numbers = #tpu.dot_dimension_numbers<[1], [0], [0], [1], [0, 0, 1, 1], [], []>} : vector<256x128xbf16>, vector<128x2xbf16>, vector<256x2xf32> -> vector<256x2xf32>
    %c0_23 = arith.constant 0 : index
    %c0_24 = arith.constant 0 : index
    %39 = vector.load %arg10[%c0_23, %c0_24] : memref<1x2xf32, #tpu.memory_space<vmem>>, vector<1x2xf32>
    %40 = vector.broadcast %39 : vector<1x2xf32> to vector<256x2xf32>
    %41 = arith.addf %38, %40 : vector<256x2xf32>
    %42 = vector.extract_strided_slice %41 {offsets = [0, 0], sizes = [256, 1], strides = [1, 1]} : vector<256x2xf32> to vector<256x1xf32>
    %43 = vector.extract_strided_slice %41 {offsets = [0, 1], sizes = [256, 1], strides = [1, 1]} : vector<256x2xf32> to vector<256x1xf32>
    %44 = arith.subf %42, %43 : vector<256x1xf32>
    %45 = math.exp %44 : vector<256x1xf32>
    %cst_25 = arith.constant 1.000000e+00 : f32
    %46 = vector.broadcast %cst_25 : f32 to vector<256x1xf32>
    %47 = arith.addf %46, %45 : vector<256x1xf32>
    %cst_26 = arith.constant 1.000000e+00 : f32
    %48 = vector.broadcast %cst_26 : f32 to vector<256x1xf32>
    %49 = arith.divf %48, %47 : vector<256x1xf32>
    %cst_27 = arith.constant 1.000000e+00 : f32
    %50 = vector.broadcast %cst_27 : f32 to vector<256x1xf32>
    %51 = arith.subf %50, %49 : vector<256x1xf32>
    %52 = tpu.iota {dimensions = array<i32: 1>} : vector<256x2xi32>
    %c0_i32 = arith.constant 0 : i32
    %53 = vector.broadcast %c0_i32 : i32 to vector<256x2xi32>
    %54 = arith.cmpi eq, %52, %53 : vector<256x2xi32>
    %55 = vector.shape_cast %51 : vector<256x1xf32> to vector<256x1xf32>
    %56 = vector.broadcast %55 : vector<256x1xf32> to vector<256x2xf32>
    %57 = vector.shape_cast %49 : vector<256x1xf32> to vector<256x1xf32>
    %58 = vector.broadcast %57 : vector<256x1xf32> to vector<256x2xf32>
    %59 = arith.select %54, %56, %58 : vector<256x2xi1>, vector<256x2xf32>
    %c0_28 = arith.constant 0 : index
    %c0_29 = arith.constant 0 : index
    %60 = vector.load %arg11[%c0_28, %c0_29] : memref<256x2xf32, #tpu.memory_space<vmem>>, vector<256x2xf32>
    tpu.vector_store %arg11[%c0_28, %c0_29], %59 {strides = array<i32>} : memref<256x2xf32, #tpu.memory_space<vmem>>, vector<256x2xf32>,
    return
  }
  func.func @transform_0(%arg0: i32, %arg1: memref<1xi32, #tpu.memory_space<smem>>) -> (i32, i32) {
    %c0_i32 = arith.constant 0 : i32
    %c0_i32_0 = arith.constant 0 : i32
    return %arg0, %c0_i32 : i32, i32
  }
  func.func @transform_1(%arg0: i32, %arg1: memref<1xi32, #tpu.memory_space<smem>>) -> (i32, i32) {
    %c0_i32 = arith.constant 0 : i32
    %c0_i32_0 = arith.constant 0 : i32
    %c0_i32_1 = arith.constant 0 : i32
    return %c0_i32, %c0_i32_0 : i32, i32
  }
  func.func @transform_2(%arg0: i32, %arg1: memref<1xi32, #tpu.memory_space<smem>>) -> (i32, i32) {
    %c0_i32 = arith.constant 0 : i32
    %c0_i32_0 = arith.constant 0 : i32
    %c0_i32_1 = arith.constant 0 : i32
    return %c0_i32, %c0_i32_0 : i32, i32
  }
  func.func @transform_3(%arg0: i32, %arg1: memref<1xi32, #tpu.memory_space<smem>>) -> (i32, i32) {
    %c0_i32 = arith.constant 0 : i32
    %c0_i32_0 = arith.constant 0 : i32
    %c0_i32_1 = arith.constant 0 : i32
    return %c0_i32, %c0_i32_0 : i32, i32
  }
  func.func @transform_4(%arg0: i32, %arg1: memref<1xi32, #tpu.memory_space<smem>>) -> (i32, i32) {
    %c0_i32 = arith.constant 0 : i32
    %c0_i32_0 = arith.constant 0 : i32
    %c0_i32_1 = arith.constant 0 : i32
    return %c0_i32, %c0_i32_0 : i32, i32
  }
  func.func @transform_5(%arg0: i32, %arg1: memref<1xi32, #tpu.memory_space<smem>>) -> (i32, i32) {
    %c0_i32 = arith.constant 0 : i32
    %c0_i32_0 = arith.constant 0 : i32
    %c0_i32_1 = arith.constant 0 : i32
    return %c0_i32, %c0_i32_0 : i32, i32
  }
  func.func @transform_6(%arg0: i32, %arg1: memref<1xi32, #tpu.memory_space<smem>>) -> (i32, i32) {
    %c0_i32 = arith.constant 0 : i32
    %c0_i32_0 = arith.constant 0 : i32
    %c0_i32_1 = arith.constant 0 : i32
    return %c0_i32, %c0_i32_0 : i32, i32
  }
  func.func @transform_7(%arg0: i32, %arg1: memref<1xi32, #tpu.memory_space<smem>>) -> (i32, i32) {
    %c0_i32 = arith.constant 0 : i32
    %c0_i32_0 = arith.constant 0 : i32
    %c0_i32_1 = arith.constant 0 : i32
    return %c0_i32, %c0_i32_0 : i32, i32
  }
  func.func @transform_8(%arg0: i32, %arg1: memref<1xi32, #tpu.memory_space<smem>>) -> (i32, i32) {
    %c0_i32 = arith.constant 0 : i32
    %c0_i32_0 = arith.constant 0 : i32
    %c0_i32_1 = arith.constant 0 : i32
    return %c0_i32, %c0_i32_0 : i32, i32
  }
  func.func @transform_9(%arg0: i32, %arg1: memref<1xi32, #tpu.memory_space<smem>>) -> (i32, i32) {
    %c0_i32 = arith.constant 0 : i32
    %c0_i32_0 = arith.constant 0 : i32
    return %arg0, %c0_i32 : i32, i32
  }
}

</mosaic_0001>

<bundles_post_ra>
// kernel: tpu_custom_call.1
= control target key start
LH: loop header
LB: loop body
LE: loop exit
PB: predicated region body
PF: predicated region fallthrough
CT: control target
= control target key end

     0   :  { %16 = vsyncpa [#allocation5], 0  ;;  %s3596_s13 = smov [#allocation4]   ;;  %s4414_s0 = inlined_call_operand.<no memory space> [shape: s32[1], index: 0, kind: input, shape index: {}]   ;;  %s4415_s1 = inlined_call_operand.vmem [shape: f32[50,10], index: 1, kind: input, shape index: {}]   ;;  %s4416_s2 = inlined_call_operand.vmem [shape: bf16[10,512], index: 2, kind: input, shape index: {}]   ;;  %s4417_s3 = inlined_call_operand.vmem [shape: f32[1,512], index: 3, kind: input, shape index: {}]   ;;  %s4418_s4 = inlined_call_operand.hbm [shape: bf16[512,128], index: 4, kind: input, shape index: {}]   ;;  %s4419_s5 = inlined_call_operand.vmem [shape: f32[1,128], index: 5, kind: input, shape index: {}]   ;;  %s4420_s6 = inlined_call_operand.vmem [shape: bf16[128,128], index: 6, kind: input, shape index: {}]   ;;  %s4421_s7 = inlined_call_operand.vmem [shape: f32[1,128], index: 7, kind: input, shape index: {}]   ;;  %s4422_s8 = inlined_call_operand.vmem [shape: bf16[128,2], index: 8, kind: input, shape index: {}]   ;;  %s4423_s9 = inlined_call_operand.vmem [shape: f32[1,2], index: 9, kind: input, shape index: {}]   ;;  %s4424_s10 = inlined_call_operand.vmem [shape: f32[50,2], index: 10, kind: output, shape index: {}]  }
   0x1   :  { %s28_s14 = sshll.u32 %s3596_s13, 4  ;;  %s3572_s17 = scalar_lea.hbm %s4418_s4, 4096  ;;  %s29_s14 = int_to_ptr.vmem [resolvable:$true] %s28_s14 }
   0x2   :  { %p3573_p0 = scmp.ne.s32.totalorder %s4418_s4, %s3572_s17  ;;  %p3576_p1 = scmp.lt.u32.totalorder %s3572_s17, %s4418_s4 }
   0x4   :  { %p3578_p2 = pnand %p3576_p1, %p3573_p0 }
   0x6   :  { %3581 = shalt.err (!%p3578_p2)
}
   0x7   :  { %s3582_s22 = scalar_lea.vmem %s29_s14, 4096  ;;  %p3587_p4 = scmp.lt.s32.totalorder %s29_s14, %s29_s14 }
   0x8   :  { %p3583_p3 = scmp.ne.s32.totalorder %s29_s14, %s3582_s22  ;;  %p3588_p5 = scmp.lt.s32.totalorder %s3582_s22, %s3582_s22 }
   0xa   :  { %p3589_p6 = por %p3588_p5, %p3587_p4 }
   0xc   :  { %p3590_p7 = pnand %p3589_p6, %p3583_p3 }
   0xe   :  { %3593 = shalt.err (!%p3590_p7)
}
   0xf   :  { %s3597_s23 = smov 64   ;;  %s3598_s24 = smov 4  }
  0x10   :  { %34 = dma.hbm_to_vmem [thread:$0]  %s4418_s4, 4096, %s29_s14, [#allocation5], %s3597_s23, %s3597_s23, %s3598_s24  }
  0x11   :  { %3594 = dma.done.wait [#allocation5], 4096  }
  0x12   :  { %3595 = vsyncadd [#allocation5], 4294963200  ;;  %v49_v0 = vlaneseq  ;;  %v3599_v1 = vmov 0   ;;  %v3679_v4 = vstv %s4414_s0  ;;  %vm385_vm0 = vcmask 1044480   ;;  %v150_v11 = vld [vmem:[%s4415_s1] sm:$0xff]  ;;  %v151_v12 = vld [vmem:[%s4415_s1 + $0x8] sm:$0xff] }
  0x13   :  { %430 = vmatprep.mubr.bf16.mxu0 %v3599_v1  ;;  %623 = vmatprep.mubr.bf16.mxu1 %v3599_v1  ;;  %v3390_v7 = vld [vmem:[%s4416_s2 + $0x4] ss:$16 sps:$4 sm:$0x1f]   ;;  %v3392_v8 = vld [vmem:[%s4416_s2 + $0xc] ss:$16 sps:$4 sm:$0x1f]  }
  0x14   :  { %v3671_v2 = vshrl.u32 %v49_v0, 7  ;;  %3388 = vset.pattern.permute.xlu1 %v3599_v1  ;;  %3389 = vset.pattern.permute.xlu0 %v3599_v1  ;;  %v3394_v9 = vld [vmem:[%s4416_s2] ss:$16 sps:$4 sm:$0x1f]   ;;  %vm336_vm3 = vcmask 80896   ;;  %v153_v19 = vld [vmem:[%s4415_s1 + $0x18] sm:$0xff] }
  0x15   :  { %2930 = vmatprep.subr.msk.bf16.mxu0 %vm385_vm0, %v3390_v7  ;;  %v3395_v10 = vld [vmem:[%s4416_s2 + $0x8] ss:$16 sps:$4 sm:$0x1f]   ;;  %2947 = vmatprep.subr.msk.bf16.mxu1 %vm385_vm0, %v3392_v8  ;;  %v387_v13 = vsel %vm385_vm0, %v3394_v9, 0  ;;  %v152_v18 = vld [vmem:[%s4415_s1 + $0x10] sm:$0xff]  ;;  %v3396_v25 = vld [vmem:[#allocation4 + $0x40] sm:$0xff]  }
  0x16   :  { %v51_v3 = vadd.s32 8, %v3671_v2  ;;  %v52_v5 = vadd.s32 16, %v3671_v2  ;;  %v53_v6 = vadd.s32 24, %v3671_v2  ;;  %vm118_vm1 = vcmp.lt.s32.totalorder %v3671_v2, %v3679_v4  ;;  %399 = vmatpush1.bf16.msra.mxu0 %v387_v13  ;;  %v3397_v26 = vld [vmem:[#allocation4] sm:$0xff]   ;;  %v155_v28 = vld [vmem:[%s4415_s1 + $0x28] sm:$0xff]  ;;  %v156_v39 = vld [vmem:[%s4415_s1 + $0x30] sm:$0xff] }
  0x17   :  { %v393_v14 = vsel %vm385_vm0, %v3395_v10, 0  ;;  %v246_v15 = vsel %vm118_vm1, %v150_v11, 0.0  ;;  %v54_v22 = vadd.s32 32, %v3671_v2  ;;  %v55_v23 = vadd.s32 40, %v3671_v2  ;;  %v154_v27 = vld [vmem:[%s4415_s1 + $0x20] sm:$0xff]  ;;  %3015 = vmatprep.subr.bf16.mxu0 %v3396_v25  ;;  %v3400_v35 = vld [vmem:[#allocation4 + $0x48] sm:$0xff]  }
  0x18   :  { %vm119_vm2 = vcmp.lt.s32.totalorder %v51_v3, %v3679_v4  ;;  %592 = vmatpush1.bf16.msra.mxu1 %v393_v14  ;;  %vm120_vm4 = vcmp.lt.s32.totalorder %v52_v5, %v3679_v4  ;;  %vm121_vm5 = vcmp.lt.s32.totalorder %v53_v6, %v3679_v4  ;;  %v3398_v29 = vld [vmem:[#allocation4 + $0xc0] sm:$0xff]   ;;  %v56_v33 = vadd.s32 48, %v3671_v2  ;;  %v3401_v36 = vld [vmem:[#allocation4 + $0x8] sm:$0xff]   ;;  %v157_v40 = vld [vmem:[%s4415_s1 + $0x38] sm:$0xff]  ;;  %s3600_s2 = smov 127  }
  0x19   :  { %v247_v16 = vsel %vm119_vm2, %v151_v12, 0.0  ;;  %v248_v20 = vsel %vm120_vm4, %v152_v18, 0.0  ;;  %v249_v21 = vsel %vm121_vm5, %v153_v19, 0.0  ;;  %vm122_vm6 = vcmp.lt.s32.totalorder %v54_v22, %v3679_v4  ;;  %v3399_v32 = vld [vmem:[#allocation4 + $0x80] sm:$0xff]   ;;  %3127 = vmatprep.subr.bf16.mxu1 %v3398_v29  ;;  %v3402_v38 = vld [vmem:[#allocation4 + $0xc8] sm:$0xff]   ;;  %v3404_v46 = vld [vmem:[#allocation4 + $0x50] sm:$0xff]  }
  0x1a   :  { %v278_v17 = vpack.c.bf16 %v247_v16, %v246_v15  ;;  %v279_v24 = vpack.c.bf16 %v249_v21, %v248_v20  ;;  %vm123_vm7 = vcmp.lt.s32.totalorder %v55_v23, %v3679_v4  ;;  %v250_v30 = vsel %vm122_vm6, %v154_v27, 0.0  ;;  %v3403_v42 = vld [vmem:[#allocation4 + $0x88] sm:$0xff]   ;;  %v158_v47 = vld [vmem:[%s4415_s1 + $0x40] sm:$0xff]  ;;  %v3405_v48 = vld [vmem:[#allocation4 + $0x10] sm:$0xff]  }
  0x1b   :  { %v251_v31 = vsel %vm123_vm7, %v155_v28, 0.0  ;;  %v57_v34 = vadd.s32 56, %v3671_v2  ;;  %vm124_vm8 = vcmp.lt.s32.totalorder %v56_v33, %v3679_v4  ;;  %v58_v41 = vadd.s32 64, %v3671_v2  ;;  %v159_v50 = vld [vmem:[%s4415_s1 + $0x48] sm:$0xff]  ;;  %v3406_v51 = vld [vmem:[#allocation4 + $0xd0] sm:$0xff]   ;;  %v3408_v54 = vld [vmem:[#allocation4 + $0x58] sm:$0xff]  }
  0x1c   :  { %2931 = vmatmul.mubr.msk.bf16.vlgmr.msra.gmra.mrb[0].mxu0 %vm336_vm3, %v278_v17  ;;  %2948 = vmatmul.mubr.msk.bf16.vlgmr.msra.gmra.mrb[0].mxu1 %vm336_vm3, %v278_v17  ;;  %v280_v37 = vpack.c.bf16 %v251_v31, %v250_v30  ;;  %v252_v43 = vsel %vm124_vm8, %v156_v39, 0.0  ;;  %v59_v45 = vadd.s32 72, %v3671_v2  ;;  %v3407_v52 = vld [vmem:[#allocation4 + $0x90] sm:$0xff]   ;;  %v60_v53 = vadd.s32 80, %v3671_v2  ;;  %v3409_v56 = vld [vmem:[#allocation4 + $0x18] sm:$0xff]   ;;  %v3412_v63 = vld [vmem:[#allocation4 + $0x60] sm:$0xff]  }
  0x1d   :  { %440 = vmatprep.mubr.bf16.mxu0 %v3599_v1  ;;  %633 = vmatprep.mubr.bf16.mxu1 %v3599_v1  ;;  %vm125_vm9 = vcmp.lt.s32.totalorder %v57_v34, %v3679_v4  ;;  %vm126_vm10 = vcmp.lt.s32.totalorder %v58_v41, %v3679_v4  ;;  %v61_v55 = vadd.s32 88, %v3671_v2  ;;  %v3410_v58 = vld [vmem:[#allocation4 + $0xd8] sm:$0xff]   ;;  %v160_v60 = vld [vmem:[%s4415_s1 + $0x50] sm:$0xff]  ;;  %v3413_v3 = vld [vmem:[#allocation4 + $0x20] sm:$0xff]   ;;  %v62_v7 = vadd.s32 96, %v3671_v2 }
  0x1e   :  { %3016 = vmatpush3.bf16.msra.mxu0 %v3397_v26  ;;  %3128 = vmatpush3.bf16.msra.mxu1 %v3399_v32  ;;  %v253_v44 = vsel %vm125_vm9, %v157_v40, 0.0  ;;  %vm127_vm11 = vcmp.lt.s32.totalorder %v59_v45, %v3679_v4  ;;  %v254_v57 = vsel %vm126_vm10, %v158_v47, 0.0  ;;  %v3411_v61 = vld [vmem:[#allocation4 + $0x98] sm:$0xff]   ;;  %vm128_vm12 = vcmp.lt.s32.totalorder %v60_v53, %v3679_v4  ;;  %v3414_v6 = vld [vmem:[#allocation4 + $0xe0] sm:$0xff]   ;;  %v3416_v10 = vld [vmem:[#allocation4 + $0x68] sm:$0xff]  }
  0x1f   :  { %3017 = vmatprep.subr.bf16.mxu0 %v3400_v35  ;;  %3129 = vmatprep.subr.bf16.mxu1 %v3402_v38  ;;  %v281_v49 = vpack.c.bf16 %v253_v44, %v252_v43  ;;  %v255_v59 = vsel %vm127_vm11, %v159_v50, 0.0  ;;  %v161_v62 = vld [vmem:[%s4415_s1 + $0x58] sm:$0xff]  ;;  %vm129_vm13 = vcmp.lt.s32.totalorder %v61_v55, %v3679_v4  ;;  %v3415_v8 = vld [vmem:[#allocation4 + $0xa0] sm:$0xff]   ;;  %v256_v9 = vsel %vm128_vm12, %v160_v60, 0.0  ;;  %v3417_v12 = vld [vmem:[#allocation4 + $0x28] sm:$0xff]  }
  0x20   :  { %v282_v5 = vpack.c.bf16 %v255_v59, %v254_v57  ;;  %v257_v11 = vsel %vm129_vm13, %v161_v62, 0.0  ;;  %v63_v13 = vadd.s32 104, %v3671_v2  ;;  %v3418_v14 = vld [vmem:[#allocation4 + $0xe8] sm:$0xff]   ;;  %v162_v15 = vld [vmem:[%s4415_s1 + $0x60] sm:$0xff]  ;;  %v64_v16 = vadd.s32 112, %v3671_v2  ;;  %v3420_v19 = vld [vmem:[#allocation4 + $0x70] sm:$0xff]  }
  0x21   :  { %v3419_v17 = vld [vmem:[#allocation4 + $0xa8] sm:$0xff]   ;;  %v65_v18 = vadd.s32 120, %v3671_v2  ;;  %vm130_vm14 = vcmp.lt.s32.totalorder %v62_v7, %v3679_v4  ;;  %v3421_v20 = vld [vmem:[#allocation4 + $0x30] sm:$0xff]   ;;  %v283_v21 = vpack.c.bf16 %v257_v11, %v256_v9  ;;  %v3424_v28 = vld [vmem:[#allocation4 + $0x78] sm:$0xff]   ;;  %v66_v29 = vadd.s32 128, %v3671_v2 }
  0x22   :  { %3018 = vmatpush3.bf16.msra.mxu0 %v3401_v36  ;;  %3130 = vmatpush3.bf16.msra.mxu1 %v3403_v42  ;;  %v163_v22 = vld [vmem:[%s4415_s1 + $0x68] sm:$0xff]  ;;  %v164_v23 = vld [vmem:[%s4415_s1 + $0x70] sm:$0xff]  ;;  %vm131_vm15 = vcmp.lt.s32.totalorder %v63_v13, %v3679_v4  ;;  %v258_v27 = vsel %vm130_vm14, %v162_v15, 0.0  ;;  %vm132_vm0 = vcmp.lt.s32.totalorder %v64_v16, %v3679_v4  ;;  %v3425_v30 = vld [vmem:[#allocation4 + $0x38] sm:$0xff]   ;;  %v67_v31 = vadd.s32 136, %v3671_v2 }
  0x23   :  { %3019 = vmatprep.subr.bf16.mxu0 %v3404_v46  ;;  %3131 = vmatprep.subr.bf16.mxu1 %v3406_v51  ;;  %v3422_v25 = vld [vmem:[#allocation4 + $0xf0] sm:$0xff]   ;;  %vm133_vm1 = vcmp.lt.s32.totalorder %v65_v18, %v3679_v4  ;;  %v3426_v32 = vld [vmem:[#allocation4 + $0xf8] sm:$0xff]   ;;  %v259_v33 = vsel %vm131_vm15, %v163_v22, 0.0  ;;  %v260_v34 = vsel %vm132_vm0, %v164_v23, 0.0  ;;  %vm134_vm2 = vcmp.lt.s32.totalorder %v66_v29, %v3679_v4  ;;  %v166_v39 = vld [vmem:[%s4415_s1 + $0x80] sm:$0xff] }
  0x24   :  { %2932 = vmatmul.mubr.msk.bf16.gmra.mrb[4].mxu0 %vm336_vm3, %v279_v24  ;;  %2949 = vmatmul.mubr.msk.bf16.gmra.mrb[4].mxu1 %vm336_vm3, %v279_v24  ;;  %v165_v24 = vld [vmem:[%s4415_s1 + $0x78] sm:$0xff]  ;;  %v3423_v26 = vld [vmem:[#allocation4 + $0xb0] sm:$0xff]   ;;  %vm135_vm4 = vcmp.lt.s32.totalorder %v67_v31, %v3679_v4  ;;  %v167_v40 = vld [vmem:[%s4415_s1 + $0x88] sm:$0xff]  ;;  %v262_v41 = vsel %vm134_vm2, %v166_v39, 0.0  ;;  %v68_v43 = vadd.s32 144, %v3671_v2  ;;  %v69_v44 = vadd.s32 152, %v3671_v2 }
  0x25   :  { %450 = vmatprep.mubr.bf16.mxu0 %v3599_v1  ;;  %643 = vmatprep.mubr.bf16.mxu1 %v3599_v1  ;;  %v261_v35 = vsel %vm133_vm1, %v165_v24, 0.0  ;;  %v3427_v36 = vld [vmem:[#allocation4 + $0xb8] sm:$0xff]   ;;  %v263_v42 = vsel %vm135_vm4, %v167_v40, 0.0  ;;  %v168_v46 = vld [vmem:[%s4415_s1 + $0x90] sm:$0xff]  ;;  %v70_v50 = vadd.s32 160, %v3671_v2  ;;  %v71_v51 = vadd.s32 168, %v3671_v2 }
  0x26   :  { %3020 = vmatpush3.bf16.msra.mxu0 %v3405_v48  ;;  %3132 = vmatpush3.bf16.msra.mxu1 %v3407_v52  ;;  %v285_v38 = vpack.c.bf16 %v261_v35, %v260_v34  ;;  %v286_v45 = vpack.c.bf16 %v263_v42, %v262_v41  ;;  %vm136_vm5 = vcmp.lt.s32.totalorder %v68_v43, %v3679_v4  ;;  %v169_v47 = vld [vmem:[%s4415_s1 + $0x98] sm:$0xff]  ;;  %v170_v53 = vld [vmem:[%s4415_s1 + $0xa0] sm:$0xff]  ;;  %v72_v57 = vadd.s32 176, %v3671_v2  ;;  %v172_v60 = vld [vmem:[%s4415_s1 + $0xb0] sm:$0xff] }
  0x27   :  { %3021 = vmatprep.subr.bf16.mxu0 %v3408_v54  ;;  %3133 = vmatprep.subr.bf16.mxu1 %v3410_v58  ;;  %vm137_vm6 = vcmp.lt.s32.totalorder %v69_v44, %v3679_v4  ;;  %v264_v48 = vsel %vm136_vm5, %v168_v46, 0.0  ;;  %vm138_vm7 = vcmp.lt.s32.totalorder %v70_v50, %v3679_v4  ;;  %vm139_vm8 = vcmp.lt.s32.totalorder %v71_v51, %v3679_v4  ;;  %v171_v54 = vld [vmem:[%s4415_s1 + $0xa8] sm:$0xff]  ;;  %v174_v7 = vld [vmem:[%s4415_s1 + $0xc0] sm:$0xff]  ;;  %v177_v15 = vld [vmem:[%s4415_s1 + $0xd8] sm:$0xff] }
  0x28   :  { %v266_v55 = vsel %vm138_vm7, %v170_v53, 0.0  ;;  %v73_v58 = vadd.s32 184, %v3671_v2  ;;  %vm140_vm9 = vcmp.lt.s32.totalorder %v72_v57, %v3679_v4  ;;  %v76_v11 = vadd.s32 208, %v3671_v2  ;;  %v179_v22 = vld [vmem:[%s4415_s1 + $0xe8] sm:$0xff]  ;;  %v181_v29 = vld [vmem:[%s4415_s1 + $0xf8] sm:$0xff] }
  0x29   :  { %v268_v62 = vsel %vm140_vm9, %v172_v60, 0.0  ;;  %v78_v18 = vadd.s32 224, %v3671_v2  ;;  %v310_v34 = vsub.s32 2, %v3671_v2  ;;  %v298_v35 = vld [vmem:[%s4417_s3] sm:$0xf]  ;;  %vm2828_vm4 = vcmask 15360  }
  0x2a   :  { %3022 = vmatpush3.bf16.msra.mxu0 %v3409_v56  ;;  %3134 = vmatpush3.bf16.msra.mxu1 %v3411_v61  ;;  %v267_v56 = vsel %vm139_vm8, %v171_v54, 0.0  ;;  %vm141_vm10 = vcmp.lt.s32.totalorder %v73_v58, %v3679_v4  ;;  %v173_v61 = vld [vmem:[%s4415_s1 + $0xb8] sm:$0xff]  ;;  %vm144_vm13 = vcmp.lt.s32.totalorder %v76_v11, %v3679_v4 }
  0x2b   :  { %3023 = vmatprep.subr.bf16.mxu0 %v3412_v63  ;;  %3135 = vmatprep.subr.bf16.mxu1 %v3414_v6  ;;  %v288_v59 = vpack.c.bf16 %v267_v56, %v266_v55  ;;  %v269_v63 = vsel %vm141_vm10, %v173_v61, 0.0  ;;  %vm146_vm15 = vcmp.lt.s32.totalorder %v78_v18, %v3679_v4 }
  0x2c   :  { %2933 = vmatmul.mubr.msk.bf16.gmra.mrb[8].mxu0 %vm336_vm3, %v280_v37  ;;  %2950 = vmatmul.mubr.msk.bf16.gmra.mrb[8].mxu1 %vm336_vm3, %v280_v37  ;;  %v284_v37 = vpack.c.bf16 %v259_v33, %v258_v27  ;;  %v289_v6 = vpack.c.bf16 %v269_v63, %v268_v62  ;;  %v302_v33 = vsub.s32 0, %v3671_v2 }
  0x2d   :  { %460 = vmatprep.mubr.bf16.mxu0 %v3599_v1  ;;  %653 = vmatprep.mubr.bf16.mxu1 %v3599_v1 }
  0x2e   :  { %3024 = vmatpush3.bf16.msra.mxu0 %v3413_v3  ;;  %3136 = vmatpush3.bf16.msra.mxu1 %v3415_v8  ;;  %v74_v3 = vadd.s32 192, %v3671_v2  ;;  %v175_v8 = vld [vmem:[%s4415_s1 + $0xc8] sm:$0xff] }
  0x2f   :  { %3025 = vmatprep.subr.bf16.mxu0 %v3416_v10  ;;  %3137 = vmatprep.subr.bf16.mxu1 %v3418_v14  ;;  %v176_v14 = vld [vmem:[%s4415_s1 + $0xd0] sm:$0xff] }
  0x30   :  { %vm142_vm11 = vcmp.lt.s32.totalorder %v74_v3, %v3679_v4  ;;  %v272_v16 = vsel %vm144_vm13, %v176_v14, 0.0  ;;  %v3429_v14 = vld [vmem:[%s4420_s6 + $0x8] sm:$0xff]  }
  0x31   :  { %v270_v9 = vsel %vm142_vm11, %v174_v7, 0.0 }
  0x32   :  { %3026 = vmatpush3.bf16.msra.mxu0 %v3417_v12  ;;  %3138 = vmatpush3.bf16.msra.mxu1 %v3419_v17  ;;  %v77_v12 = vadd.s32 216, %v3671_v2 }
  0x33   :  { %3027 = vmatprep.subr.bf16.mxu0 %v3420_v19  ;;  %3139 = vmatprep.subr.bf16.mxu1 %v3422_v25  ;;  %v79_v19 = vadd.s32 232, %v3671_v2  ;;  %v80_v25 = vadd.s32 240, %v3671_v2 }
  0x34   :  { %2934 = vmatmul.mubr.msk.bf16.gmra.mrb[12].mxu0 %vm336_vm3, %v281_v49  ;;  %2951 = vmatmul.mubr.msk.bf16.gmra.mrb[12].mxu1 %vm336_vm3, %v281_v49  ;;  %v265_v49 = vsel %vm137_vm6, %v169_v47, 0.0  ;;  %vm145_vm14 = vcmp.lt.s32.totalorder %v77_v12, %v3679_v4 }
  0x35   :  { %470 = vmatprep.mubr.bf16.mxu0 %v3599_v1  ;;  %663 = vmatprep.mubr.bf16.mxu1 %v3599_v1  ;;  %v287_v52 = vpack.c.bf16 %v265_v49, %v264_v48  ;;  %v273_v17 = vsel %vm145_vm14, %v177_v15, 0.0  ;;  %vm147_vm0 = vcmp.lt.s32.totalorder %v79_v19, %v3679_v4  ;;  %vm148_vm1 = vcmp.lt.s32.totalorder %v80_v25, %v3679_v4 }
  0x36   :  { %3028 = vmatpush3.bf16.msra.mxu0 %v3421_v20  ;;  %3140 = vmatpush3.bf16.msra.mxu1 %v3423_v26  ;;  %v291_v20 = vpack.c.bf16 %v273_v17, %v272_v16  ;;  %v275_v24 = vsel %vm147_vm0, %v179_v22, 0.0  ;;  %v81_v26 = vadd.s32 248, %v3671_v2 }
  0x37   :  { %3029 = vmatprep.subr.bf16.mxu0 %v3424_v28  ;;  %3141 = vmatprep.subr.bf16.mxu1 %v3426_v32  ;;  %v180_v28 = vld [vmem:[%s4415_s1 + $0xf0] sm:$0xff] }
  0x38   :  { %vm149_vm2 = vcmp.lt.s32.totalorder %v81_v26, %v3679_v4 }
  0x39   :  { %v277_v31 = vsel %vm149_vm2, %v181_v29, 0.0 }
  0x3a   :  { %3030 = vmatpush3.bf16.msra.mxu0 %v3425_v30  ;;  %3142 = vmatpush3.bf16.msra.mxu1 %v3427_v36  ;;  %v276_v30 = vsel %vm148_vm1, %v180_v28, 0.0  ;;  %v314_v36 = vsub.s32 3, %v3671_v2 }
  0x3b   :  { %v293_v32 = vpack.c.bf16 %v277_v31, %v276_v30  ;;  %v3430_v30 = vld [vmem:[%s4420_s6 + $0x10] sm:$0xff]  }
  0x3c   :  { %2935 = vmatmul.mubr.msk.bf16.gmra.mrb[16].mxu0 %vm336_vm3, %v282_v5  ;;  %2952 = vmatmul.mubr.msk.bf16.gmra.mrb[16].mxu1 %vm336_vm3, %v282_v5  ;;  %v75_v5 = vadd.s32 200, %v3671_v2  ;;  %v3932_v40 = vrot.slane %v298_v35, %v314_v36 }
  0x3d   :  { %480 = vmatprep.mubr.bf16.mxu0 %v3599_v1  ;;  %673 = vmatprep.mubr.bf16.mxu1 %v3599_v1 }
  0x3e   :  { %vm143_vm12 = vcmp.lt.s32.totalorder %v75_v5, %v3679_v4  ;;  %v3428_v4 = vld [vmem:[%s4420_s6] sm:$0xff]  }
  0x3f   :  { %v271_v10 = vsel %vm143_vm12, %v175_v8, 0.0  ;;  %3287 = vmatprep.subr.bf16.mxu0 %v3428_v4 }
  0x40   :  { %v290_v13 = vpack.c.bf16 %v271_v10, %v270_v9 }
  0x44   :  { %2936 = vmatmul.mubr.msk.bf16.gmra.mrb[20].mxu0 %vm336_vm3, %v283_v21  ;;  %2953 = vmatmul.mubr.msk.bf16.gmra.mrb[20].mxu1 %vm336_vm3, %v283_v21  ;;  %v178_v21 = vld [vmem:[%s4415_s1 + $0xe0] sm:$0xff] }
  0x45   :  { %490 = vmatprep.mubr.bf16.mxu0 %v3599_v1  ;;  %683 = vmatprep.mubr.bf16.mxu1 %v3599_v1  ;;  %v274_v23 = vsel %vm146_vm15, %v178_v21, 0.0 }
  0x46   :  { %v292_v27 = vpack.c.bf16 %v275_v24, %v274_v23 }
  0x4c   :  { %2937 = vmatmul.mubr.msk.bf16.gmra.mrb[24].mxu0 %vm336_vm3, %v284_v37  ;;  %2954 = vmatmul.mubr.msk.bf16.gmra.mrb[24].mxu1 %vm336_vm3, %v284_v37  ;;  %v3926_v37 = vrot.slane %v298_v35, %v302_v33 }
  0x4d   :  { %500 = vmatprep.mubr.bf16.mxu0 %v3599_v1  ;;  %693 = vmatprep.mubr.bf16.mxu1 %v3599_v1 }
  0x54   :  { %2938 = vmatmul.mubr.msk.bf16.gmra.mrb[28].mxu0 %vm336_vm3, %v285_v38  ;;  %2955 = vmatmul.mubr.msk.bf16.gmra.mrb[28].mxu1 %vm336_vm3, %v285_v38  ;;  %v3928_v38 = vrot.slane %v298_v35, %v310_v34 }
  0x55   :  { %510 = vmatprep.mubr.bf16.mxu0 %v3599_v1  ;;  %703 = vmatprep.mubr.bf16.mxu1 %v3599_v1 }
  0x5c   :  { %2939 = vmatmul.mubr.msk.bf16.gmra.mrb[32].mxu0 %vm336_vm3, %v286_v45  ;;  %2956 = vmatmul.mubr.msk.bf16.gmra.mrb[32].mxu1 %vm336_vm3, %v286_v45 }
  0x5d   :  { %520 = vmatprep.mubr.bf16.mxu0 %v3599_v1  ;;  %713 = vmatprep.mubr.bf16.mxu1 %v3599_v1 }
  0x64   :  { %2940 = vmatmul.mubr.msk.bf16.gmra.mrb[36].mxu0 %vm336_vm3, %v287_v52  ;;  %2957 = vmatmul.mubr.msk.bf16.gmra.mrb[36].mxu1 %vm336_vm3, %v287_v52 }
  0x65   :  { %530 = vmatprep.mubr.bf16.mxu0 %v3599_v1  ;;  %723 = vmatprep.mubr.bf16.mxu1 %v3599_v1 }
  0x6c   :  { %2941 = vmatmul.mubr.msk.bf16.gmra.mrb[40].mxu0 %vm336_vm3, %v288_v59  ;;  %2958 = vmatmul.mubr.msk.bf16.gmra.mrb[40].mxu1 %vm336_vm3, %v288_v59 }
  0x6d   :  { %540 = vmatprep.mubr.bf16.mxu0 %v3599_v1  ;;  %733 = vmatprep.mubr.bf16.mxu1 %v3599_v1 }
  0x74   :  { %2942 = vmatmul.mubr.msk.bf16.gmra.mrb[44].mxu0 %vm336_vm3, %v289_v6  ;;  %2959 = vmatmul.mubr.msk.bf16.gmra.mrb[44].mxu1 %vm336_vm3, %v289_v6 }
  0x75   :  { %550 = vmatprep.mubr.bf16.mxu0 %v3599_v1  ;;  %743 = vmatprep.mubr.bf16.mxu1 %v3599_v1 }
  0x7c   :  { %2943 = vmatmul.mubr.msk.bf16.gmra.mrb[48].mxu0 %vm336_vm3, %v290_v13  ;;  %2960 = vmatmul.mubr.msk.bf16.gmra.mrb[48].mxu1 %vm336_vm3, %v290_v13 }
  0x7d   :  { %560 = vmatprep.mubr.bf16.mxu0 %v3599_v1  ;;  %753 = vmatprep.mubr.bf16.mxu1 %v3599_v1 }
  0x84   :  { %2944 = vmatmul.mubr.msk.bf16.gmra.mrb[52].mxu0 %vm336_vm3, %v291_v20  ;;  %2961 = vmatmul.mubr.msk.bf16.gmra.mrb[52].mxu1 %vm336_vm3, %v291_v20 }
  0x85   :  { %570 = vmatprep.mubr.bf16.mxu0 %v3599_v1  ;;  %763 = vmatprep.mubr.bf16.mxu1 %v3599_v1 }
  0x8c   :  { %2945 = vmatmul.mubr.msk.bf16.gmra.mrb[56].mxu0 %vm336_vm3, %v292_v27  ;;  %2962 = vmatmul.mubr.msk.bf16.gmra.mrb[56].mxu1 %vm336_vm3, %v292_v27 }
  0x8d   :  { %580 = vmatprep.mubr.bf16.mxu0 %v3599_v1  ;;  %773 = vmatprep.mubr.bf16.mxu1 %v3599_v1  ;;  %v306_v1 = vsub.s32 1, %v3671_v2 }
  0x8f   :  { %v3930_v39 = vrot.slane %v298_v35, %v306_v1 }
  0x94   :  { %2946 = vmatmul.mubr.msk.bf16.gmra.mrb[60].mxu0 %vm336_vm3, %v293_v32  ;;  %2963 = vmatmul.mubr.msk.bf16.gmra.mrb[60].mxu1 %vm336_vm3, %v293_v32 }
  0xef   :  { %v432_v41 = vpop.f32.mrb[0].mxu0  ;;  %v625_v42 = vpop.f32.mrb[0].mxu1 }
  0xf0   :  { %v433_v43 = vadd.f32 %v432_v41, %v3926_v37  ;;  %v626_v44 = vadd.f32 %v625_v42, %v3928_v38  ;;  %v434_v45 = vpop.f32.mrb[1].mxu0  ;;  %v627_v46 = vpop.f32.mrb[1].mxu1 }
  0xf1   :  { %v435_v47 = vadd.f32 %v434_v45, %v3930_v39  ;;  %v628_v2 = vadd.f32 %v627_v46, %v3932_v40  ;;  %v436_v48 = vpop.f32.mrb[2].mxu0  ;;  %v629_v49 = vpop.f32.mrb[2].mxu1  ;;  %v3431_v46 = vld [vmem:[%s4420_s6 + $0x18] sm:$0xff]  }
  0xf2   :  { %v786_v50 = vmax.f32 %v626_v44, 0.0  ;;  %v437_v51 = vadd.f32 %v436_v48, %v3926_v37  ;;  %v630_v52 = vadd.f32 %v629_v49, %v3928_v38  ;;  %v438_v53 = vpop.f32.mrb[3].mxu0  ;;  %v631_v54 = vpop.f32.mrb[3].mxu1  ;;  %v784_v58 = vmax.f32 %v433_v43, 0.0 }
  0xf3   :  { %v787_v55 = vmax.f32 %v628_v2, 0.0  ;;  %v439_v56 = vadd.f32 %v438_v53, %v3930_v39  ;;  %v632_v57 = vadd.f32 %v631_v54, %v3932_v40  ;;  %v785_v61 = vmax.f32 %v435_v47, 0.0 }
  0xf4   :  { %v788_v59 = vmax.f32 %v437_v51, 0.0  ;;  %v790_v60 = vmax.f32 %v630_v52, 0.0 }
  0xf5   :  { %v789_v62 = vmax.f32 %v439_v56, 0.0  ;;  %v791_v63 = vmax.f32 %v632_v57, 0.0 }
  0xf6   :  { %v912_v3 = vpack.c.bf16 %v788_v59, %v784_v58  ;;  %v914_v5 = vpack.c.bf16 %v790_v60, %v786_v50 }
  0xf7   :  { %v913_v6 = vpack.c.bf16 %v789_v62, %v785_v61  ;;  %v915_v7 = vpack.c.bf16 %v791_v63, %v787_v55  ;;  %v442_v8 = vpop.f32.mrb[4].mxu0  ;;  %v635_v9 = vpop.f32.mrb[4].mxu1  ;;  %v3432_v61 = vld [vmem:[%s4420_s6 + $0x20] sm:$0xff]  }
  0xf8   :  { %v443_v10 = vadd.f32 %v442_v8, %v3926_v37  ;;  %v636_v11 = vadd.f32 %v635_v9, %v3928_v38  ;;  %v444_v12 = vpop.f32.mrb[5].mxu0  ;;  %v637_v13 = vpop.f32.mrb[5].mxu1 }
  0xf9   :  { %v445_v15 = vadd.f32 %v444_v12, %v3930_v39  ;;  %v638_v16 = vadd.f32 %v637_v13, %v3932_v40  ;;  %v446_v17 = vpop.f32.mrb[6].mxu0  ;;  %v639_v18 = vpop.f32.mrb[6].mxu1  ;;  %1271 = vmatprep.mubr.bf16.mxu0 %v913_v6  ;;  %1432 = vmatprep.mubr.bf16.mxu1 %v915_v7 }
  0xfa   :  { %v794_v19 = vmax.f32 %v636_v11, 0.0  ;;  %v447_v20 = vadd.f32 %v446_v17, %v3926_v37  ;;  %v640_v21 = vadd.f32 %v639_v18, %v3928_v38  ;;  %v448_v22 = vpop.f32.mrb[7].mxu0  ;;  %v641_v23 = vpop.f32.mrb[7].mxu1  ;;  %1272 = vmatmul.mubr.bf16.vlgmr.msra.gmra.mrb[64].mxu0 %v912_v3  ;;  %1433 = vmatmul.mubr.bf16.vlgmr.msra.gmra.mrb[64].mxu1 %v914_v5  ;;  %v792_v27 = vmax.f32 %v443_v10, 0.0 }
  0xfb   :  { %v795_v24 = vmax.f32 %v638_v16, 0.0  ;;  %v449_v25 = vadd.f32 %v448_v22, %v3930_v39  ;;  %v642_v26 = vadd.f32 %v641_v23, %v3932_v40  ;;  %3288 = vmatpush3.bf16.msra.mxu0 %v3428_v4  ;;  %v793_v31 = vmax.f32 %v445_v15, 0.0  ;;  %v3433_v15 = vld [vmem:[%s4420_s6 + $0x28] sm:$0xff]  }
  0xfc   :  { %v796_v28 = vmax.f32 %v447_v20, 0.0  ;;  %v798_v29 = vmax.f32 %v640_v21, 0.0  ;;  %3289 = vmatprep.subr.bf16.mxu0 %v3429_v14 }
  0xfd   :  { %v797_v32 = vmax.f32 %v449_v25, 0.0  ;;  %v799_v33 = vmax.f32 %v642_v26, 0.0 }
  0xfe   :  { %v916_v34 = vpack.c.bf16 %v796_v28, %v792_v27  ;;  %v918_v35 = vpack.c.bf16 %v798_v29, %v794_v19 }
  0xff   :  { %v917_v1 = vpack.c.bf16 %v797_v32, %v793_v31  ;;  %v919_v36 = vpack.c.bf16 %v799_v33, %v795_v24  ;;  %v452_v41 = vpop.f32.mrb[8].mxu0  ;;  %v645_v42 = vpop.f32.mrb[8].mxu1  ;;  %3290 = vmatpush3.bf16.msra.mxu0 %v3429_v14  ;;  %v3434_v31 = vld [vmem:[%s4420_s6 + $0x30] sm:$0xff]  }
 0x100   :  { %v453_v4 = vadd.f32 %v452_v41, %v3926_v37  ;;  %v646_v43 = vadd.f32 %v645_v42, %v3928_v38  ;;  %v454_v44 = vpop.f32.mrb[9].mxu0  ;;  %v647_v45 = vpop.f32.mrb[9].mxu1  ;;  %3291 = vmatprep.subr.bf16.mxu0 %v3430_v30 }
 0x101   :  { %v455_v47 = vadd.f32 %v454_v44, %v3930_v39  ;;  %v648_v2 = vadd.f32 %v647_v45, %v3932_v40  ;;  %v456_v48 = vpop.f32.mrb[10].mxu0  ;;  %v649_v49 = vpop.f32.mrb[10].mxu1  ;;  %1279 = vmatprep.mubr.bf16.mxu0 %v917_v1  ;;  %1440 = vmatprep.mubr.bf16.mxu1 %v919_v36 }
 0x102   :  { %v802_v50 = vmax.f32 %v646_v43, 0.0  ;;  %v457_v51 = vadd.f32 %v456_v48, %v3926_v37  ;;  %v650_v52 = vadd.f32 %v649_v49, %v3928_v38  ;;  %v458_v53 = vpop.f32.mrb[11].mxu0  ;;  %v651_v54 = vpop.f32.mrb[11].mxu1  ;;  %1280 = vmatmul.mubr.bf16.gmra.mrb[68].mxu0 %v916_v34  ;;  %1441 = vmatmul.mubr.bf16.gmra.mrb[68].mxu1 %v918_v35  ;;  %v800_v58 = vmax.f32 %v453_v4, 0.0 }
 0x103   :  { %v803_v55 = vmax.f32 %v648_v2, 0.0  ;;  %v459_v56 = vadd.f32 %v458_v53, %v3930_v39  ;;  %v652_v57 = vadd.f32 %v651_v54, %v3932_v40  ;;  %3292 = vmatpush3.bf16.msra.mxu0 %v3430_v30  ;;  %v801_v62 = vmax.f32 %v455_v47, 0.0 }
 0x104   :  { %v804_v59 = vmax.f32 %v457_v51, 0.0  ;;  %v806_v60 = vmax.f32 %v650_v52, 0.0  ;;  %3293 = vmatprep.subr.bf16.mxu0 %v3431_v46 }
 0x105   :  { %v805_v63 = vmax.f32 %v459_v56, 0.0  ;;  %v807_v3 = vmax.f32 %v652_v57, 0.0 }
 0x106   :  { %v920_v5 = vpack.c.bf16 %v804_v59, %v800_v58  ;;  %v922_v6 = vpack.c.bf16 %v806_v60, %v802_v50 }
 0x107   :  { %v921_v7 = vpack.c.bf16 %v805_v63, %v801_v62  ;;  %v923_v8 = vpack.c.bf16 %v807_v3, %v803_v55  ;;  %v462_v9 = vpop.f32.mrb[12].mxu0  ;;  %v655_v10 = vpop.f32.mrb[12].mxu1  ;;  %3294 = vmatpush3.bf16.msra.mxu0 %v3431_v46 }
 0x108   :  { %v463_v11 = vadd.f32 %v462_v9, %v3926_v37  ;;  %v656_v12 = vadd.f32 %v655_v10, %v3928_v38  ;;  %v464_v13 = vpop.f32.mrb[13].mxu0  ;;  %v657_v14 = vpop.f32.mrb[13].mxu1  ;;  %3295 = vmatprep.subr.bf16.mxu0 %v3432_v61 }
 0x109   :  { %v465_v16 = vadd.f32 %v464_v13, %v3930_v39  ;;  %v658_v17 = vadd.f32 %v657_v14, %v3932_v40  ;;  %v466_v18 = vpop.f32.mrb[14].mxu0  ;;  %v659_v19 = vpop.f32.mrb[14].mxu1  ;;  %1287 = vmatprep.mubr.bf16.mxu0 %v921_v7  ;;  %1448 = vmatprep.mubr.bf16.mxu1 %v923_v8 }
 0x10a   :  { %v810_v20 = vmax.f32 %v656_v12, 0.0  ;;  %v467_v21 = vadd.f32 %v466_v18, %v3926_v37  ;;  %v660_v22 = vadd.f32 %v659_v19, %v3928_v38  ;;  %v468_v23 = vpop.f32.mrb[15].mxu0  ;;  %v661_v24 = vpop.f32.mrb[15].mxu1  ;;  %1288 = vmatmul.mubr.bf16.gmra.mrb[72].mxu0 %v920_v5  ;;  %1449 = vmatmul.mubr.bf16.gmra.mrb[72].mxu1 %v922_v6  ;;  %v808_v28 = vmax.f32 %v463_v11, 0.0 }
 0x10b   :  { %v811_v25 = vmax.f32 %v658_v17, 0.0  ;;  %v469_v26 = vadd.f32 %v468_v23, %v3930_v39  ;;  %v662_v27 = vadd.f32 %v661_v24, %v3932_v40  ;;  %3296 = vmatpush3.bf16.msra.mxu0 %v3432_v61  ;;  %v809_v32 = vmax.f32 %v465_v16, 0.0 }
 0x10c   :  { %v812_v29 = vmax.f32 %v467_v21, 0.0  ;;  %v814_v30 = vmax.f32 %v660_v22, 0.0  ;;  %3297 = vmatprep.subr.bf16.mxu0 %v3433_v15 }
 0x10d   :  { %v813_v33 = vmax.f32 %v469_v26, 0.0  ;;  %v815_v34 = vmax.f32 %v662_v27, 0.0 }
 0x10e   :  { %v924_v35 = vpack.c.bf16 %v812_v29, %v808_v28  ;;  %v926_v1 = vpack.c.bf16 %v814_v30, %v810_v20 }
 0x10f   :  { %v925_v36 = vpack.c.bf16 %v813_v33, %v809_v32  ;;  %v927_v41 = vpack.c.bf16 %v815_v34, %v811_v25  ;;  %v472_v42 = vpop.f32.mrb[16].mxu0  ;;  %v665_v4 = vpop.f32.mrb[16].mxu1  ;;  %3298 = vmatpush3.bf16.msra.mxu0 %v3433_v15 }
 0x110   :  { %v473_v43 = vadd.f32 %v472_v42, %v3926_v37  ;;  %v666_v44 = vadd.f32 %v665_v4, %v3928_v38  ;;  %v474_v45 = vpop.f32.mrb[17].mxu0  ;;  %v667_v46 = vpop.f32.mrb[17].mxu1  ;;  %3299 = vmatprep.subr.bf16.mxu0 %v3434_v31 }
 0x111   :  { %v475_v47 = vadd.f32 %v474_v45, %v3930_v39  ;;  %v668_v2 = vadd.f32 %v667_v46, %v3932_v40  ;;  %v476_v48 = vpop.f32.mrb[18].mxu0  ;;  %v669_v49 = vpop.f32.mrb[18].mxu1  ;;  %1295 = vmatprep.mubr.bf16.mxu0 %v925_v36  ;;  %1456 = vmatprep.mubr.bf16.mxu1 %v927_v41 }
 0x112   :  { %v818_v50 = vmax.f32 %v666_v44, 0.0  ;;  %v477_v51 = vadd.f32 %v476_v48, %v3926_v37  ;;  %v670_v52 = vadd.f32 %v669_v49, %v3928_v38  ;;  %v478_v53 = vpop.f32.mrb[19].mxu0  ;;  %v671_v54 = vpop.f32.mrb[19].mxu1  ;;  %1296 = vmatmul.mubr.bf16.gmra.mrb[76].mxu0 %v924_v35  ;;  %1457 = vmatmul.mubr.bf16.gmra.mrb[76].mxu1 %v926_v1  ;;  %v816_v58 = vmax.f32 %v473_v43, 0.0 }
 0x113   :  { %v819_v55 = vmax.f32 %v668_v2, 0.0  ;;  %v479_v56 = vadd.f32 %v478_v53, %v3930_v39  ;;  %v672_v57 = vadd.f32 %v671_v54, %v3932_v40  ;;  %3300 = vmatpush3.bf16.msra.mxu0 %v3434_v31  ;;  %v817_v61 = vmax.f32 %v475_v47, 0.0 }
 0x114   :  { %v820_v59 = vmax.f32 %v477_v51, 0.0  ;;  %v822_v60 = vmax.f32 %v670_v52, 0.0 }
 0x115   :  { %v821_v62 = vmax.f32 %v479_v56, 0.0  ;;  %v823_v63 = vmax.f32 %v672_v57, 0.0 }
 0x116   :  { %v928_v3 = vpack.c.bf16 %v820_v59, %v816_v58  ;;  %v930_v5 = vpack.c.bf16 %v822_v60, %v818_v50 }
 0x117   :  { %v929_v6 = vpack.c.bf16 %v821_v62, %v817_v61  ;;  %v931_v7 = vpack.c.bf16 %v823_v63, %v819_v55  ;;  %v482_v8 = vpop.f32.mrb[20].mxu0  ;;  %v675_v9 = vpop.f32.mrb[20].mxu1 }
 0x118   :  { %v483_v10 = vadd.f32 %v482_v8, %v3926_v37  ;;  %v676_v11 = vadd.f32 %v675_v9, %v3928_v38  ;;  %v484_v12 = vpop.f32.mrb[21].mxu0  ;;  %v677_v13 = vpop.f32.mrb[21].mxu1 }
 0x119   :  { %v485_v14 = vadd.f32 %v484_v12, %v3930_v39  ;;  %v678_v15 = vadd.f32 %v677_v13, %v3932_v40  ;;  %v486_v16 = vpop.f32.mrb[22].mxu0  ;;  %v679_v17 = vpop.f32.mrb[22].mxu1  ;;  %1303 = vmatprep.mubr.bf16.mxu0 %v929_v6  ;;  %1464 = vmatprep.mubr.bf16.mxu1 %v931_v7 }
 0x11a   :  { %v826_v18 = vmax.f32 %v676_v11, 0.0  ;;  %v487_v19 = vadd.f32 %v486_v16, %v3926_v37  ;;  %v680_v20 = vadd.f32 %v679_v17, %v3928_v38  ;;  %v488_v21 = vpop.f32.mrb[23].mxu0  ;;  %v681_v22 = vpop.f32.mrb[23].mxu1  ;;  %1304 = vmatmul.mubr.bf16.gmra.mrb[80].mxu0 %v928_v3  ;;  %1465 = vmatmul.mubr.bf16.gmra.mrb[80].mxu1 %v930_v5  ;;  %v824_v26 = vmax.f32 %v483_v10, 0.0 }
 0x11b   :  { %v827_v23 = vmax.f32 %v678_v15, 0.0  ;;  %v489_v24 = vadd.f32 %v488_v21, %v3930_v39  ;;  %v682_v25 = vadd.f32 %v681_v22, %v3932_v40  ;;  %v825_v29 = vmax.f32 %v485_v14, 0.0 }
 0x11c   :  { %v828_v27 = vmax.f32 %v487_v19, 0.0  ;;  %v830_v28 = vmax.f32 %v680_v20, 0.0 }
 0x11d   :  { %v829_v30 = vmax.f32 %v489_v24, 0.0  ;;  %v831_v31 = vmax.f32 %v682_v25, 0.0 }
 0x11e   :  { %v932_v32 = vpack.c.bf16 %v828_v27, %v824_v26  ;;  %v934_v33 = vpack.c.bf16 %v830_v28, %v826_v18 }
 0x11f   :  { %v933_v34 = vpack.c.bf16 %v829_v30, %v825_v29  ;;  %v935_v35 = vpack.c.bf16 %v831_v31, %v827_v23  ;;  %v492_v1 = vpop.f32.mrb[24].mxu0  ;;  %v685_v36 = vpop.f32.mrb[24].mxu1 }
 0x120   :  { %v493_v41 = vadd.f32 %v492_v1, %v3926_v37  ;;  %v686_v42 = vadd.f32 %v685_v36, %v3928_v38  ;;  %v494_v4 = vpop.f32.mrb[25].mxu0  ;;  %v687_v43 = vpop.f32.mrb[25].mxu1 }
 0x121   :  { %v495_v44 = vadd.f32 %v494_v4, %v3930_v39  ;;  %v688_v45 = vadd.f32 %v687_v43, %v3932_v40  ;;  %v496_v46 = vpop.f32.mrb[26].mxu0  ;;  %v689_v47 = vpop.f32.mrb[26].mxu1  ;;  %1311 = vmatprep.mubr.bf16.mxu0 %v933_v34  ;;  %1472 = vmatprep.mubr.bf16.mxu1 %v935_v35 }
 0x122   :  { %v834_v2 = vmax.f32 %v686_v42, 0.0  ;;  %v497_v48 = vadd.f32 %v496_v46, %v3926_v37  ;;  %v690_v49 = vadd.f32 %v689_v47, %v3928_v38  ;;  %v498_v50 = vpop.f32.mrb[27].mxu0  ;;  %v691_v51 = vpop.f32.mrb[27].mxu1  ;;  %1312 = vmatmul.mubr.bf16.gmra.mrb[84].mxu0 %v932_v32  ;;  %1473 = vmatmul.mubr.bf16.gmra.mrb[84].mxu1 %v934_v33  ;;  %v832_v55 = vmax.f32 %v493_v41, 0.0 }
 0x123   :  { %v835_v52 = vmax.f32 %v688_v45, 0.0  ;;  %v499_v53 = vadd.f32 %v498_v50, %v3930_v39  ;;  %v692_v54 = vadd.f32 %v691_v51, %v3932_v40  ;;  %v833_v58 = vmax.f32 %v495_v44, 0.0 }
 0x124   :  { %v836_v56 = vmax.f32 %v497_v48, 0.0  ;;  %v838_v57 = vmax.f32 %v690_v49, 0.0 }
 0x125   :  { %v837_v59 = vmax.f32 %v499_v53, 0.0  ;;  %v839_v60 = vmax.f32 %v692_v54, 0.0 }
 0x126   :  { %v936_v61 = vpack.c.bf16 %v836_v56, %v832_v55  ;;  %v938_v62 = vpack.c.bf16 %v838_v57, %v834_v2 }
 0x127   :  { %v937_v63 = vpack.c.bf16 %v837_v59, %v833_v58  ;;  %v939_v3 = vpack.c.bf16 %v839_v60, %v835_v52  ;;  %v502_v5 = vpop.f32.mrb[28].mxu0  ;;  %v695_v6 = vpop.f32.mrb[28].mxu1 }
 0x128   :  { %v503_v7 = vadd.f32 %v502_v5, %v3926_v37  ;;  %v696_v8 = vadd.f32 %v695_v6, %v3928_v38  ;;  %v504_v9 = vpop.f32.mrb[29].mxu0  ;;  %v697_v10 = vpop.f32.mrb[29].mxu1 }
 0x129   :  { %v505_v11 = vadd.f32 %v504_v9, %v3930_v39  ;;  %v698_v12 = vadd.f32 %v697_v10, %v3932_v40  ;;  %v506_v13 = vpop.f32.mrb[30].mxu0  ;;  %v699_v14 = vpop.f32.mrb[30].mxu1  ;;  %1319 = vmatprep.mubr.bf16.mxu0 %v937_v63  ;;  %1480 = vmatprep.mubr.bf16.mxu1 %v939_v3 }
 0x12a   :  { %v842_v15 = vmax.f32 %v696_v8, 0.0  ;;  %v507_v16 = vadd.f32 %v506_v13, %v3926_v37  ;;  %v700_v17 = vadd.f32 %v699_v14, %v3928_v38  ;;  %v508_v18 = vpop.f32.mrb[31].mxu0  ;;  %v701_v19 = vpop.f32.mrb[31].mxu1  ;;  %1320 = vmatmul.mubr.bf16.gmra.mrb[88].mxu0 %v936_v61  ;;  %1481 = vmatmul.mubr.bf16.gmra.mrb[88].mxu1 %v938_v62  ;;  %v840_v23 = vmax.f32 %v503_v7, 0.0 }
 0x12b   :  { %v843_v20 = vmax.f32 %v698_v12, 0.0  ;;  %v509_v21 = vadd.f32 %v508_v18, %v3930_v39  ;;  %v702_v22 = vadd.f32 %v701_v19, %v3932_v40  ;;  %v841_v26 = vmax.f32 %v505_v11, 0.0 }
 0x12c   :  { %v844_v24 = vmax.f32 %v507_v16, 0.0  ;;  %v846_v25 = vmax.f32 %v700_v17, 0.0 }
 0x12d   :  { %v845_v27 = vmax.f32 %v509_v21, 0.0  ;;  %v847_v28 = vmax.f32 %v702_v22, 0.0 }
 0x12e   :  { %v940_v29 = vpack.c.bf16 %v844_v24, %v840_v23  ;;  %v942_v30 = vpack.c.bf16 %v846_v25, %v842_v15 }
 0x12f   :  { %v941_v31 = vpack.c.bf16 %v845_v27, %v841_v26  ;;  %v943_v32 = vpack.c.bf16 %v847_v28, %v843_v20  ;;  %v512_v33 = vpop.f32.mrb[32].mxu0  ;;  %v705_v34 = vpop.f32.mrb[32].mxu1 }
 0x130   :  { %v513_v35 = vadd.f32 %v512_v33, %v3926_v37  ;;  %v706_v1 = vadd.f32 %v705_v34, %v3928_v38  ;;  %v514_v36 = vpop.f32.mrb[33].mxu0  ;;  %v707_v41 = vpop.f32.mrb[33].mxu1 }
 0x131   :  { %v515_v42 = vadd.f32 %v514_v36, %v3930_v39  ;;  %v708_v4 = vadd.f32 %v707_v41, %v3932_v40  ;;  %v516_v43 = vpop.f32.mrb[34].mxu0  ;;  %v709_v44 = vpop.f32.mrb[34].mxu1  ;;  %1327 = vmatprep.mubr.bf16.mxu0 %v941_v31  ;;  %1488 = vmatprep.mubr.bf16.mxu1 %v943_v32 }
 0x132   :  { %v850_v45 = vmax.f32 %v706_v1, 0.0  ;;  %v517_v46 = vadd.f32 %v516_v43, %v3926_v37  ;;  %v710_v47 = vadd.f32 %v709_v44, %v3928_v38  ;;  %v518_v2 = vpop.f32.mrb[35].mxu0  ;;  %v711_v48 = vpop.f32.mrb[35].mxu1  ;;  %1328 = vmatmul.mubr.bf16.gmra.mrb[92].mxu0 %v940_v29  ;;  %1489 = vmatmul.mubr.bf16.gmra.mrb[92].mxu1 %v942_v30  ;;  %v848_v52 = vmax.f32 %v513_v35, 0.0 }
 0x133   :  { %v851_v49 = vmax.f32 %v708_v4, 0.0  ;;  %v519_v50 = vadd.f32 %v518_v2, %v3930_v39  ;;  %v712_v51 = vadd.f32 %v711_v48, %v3932_v40  ;;  %v849_v55 = vmax.f32 %v515_v42, 0.0 }
 0x134   :  { %v852_v53 = vmax.f32 %v517_v46, 0.0  ;;  %v854_v54 = vmax.f32 %v710_v47, 0.0 }
 0x135   :  { %v853_v56 = vmax.f32 %v519_v50, 0.0  ;;  %v855_v57 = vmax.f32 %v712_v51, 0.0 }
 0x136   :  { %v944_v58 = vpack.c.bf16 %v852_v53, %v848_v52  ;;  %v946_v59 = vpack.c.bf16 %v854_v54, %v850_v45 }
 0x137   :  { %v945_v60 = vpack.c.bf16 %v853_v56, %v849_v55  ;;  %v947_v61 = vpack.c.bf16 %v855_v57, %v851_v49  ;;  %v522_v62 = vpop.f32.mrb[36].mxu0  ;;  %v715_v63 = vpop.f32.mrb[36].mxu1 }
 0x138   :  { %v523_v3 = vadd.f32 %v522_v62, %v3926_v37  ;;  %v716_v5 = vadd.f32 %v715_v63, %v3928_v38  ;;  %v524_v6 = vpop.f32.mrb[37].mxu0  ;;  %v717_v7 = vpop.f32.mrb[37].mxu1 }
 0x139   :  { %v525_v8 = vadd.f32 %v524_v6, %v3930_v39  ;;  %v718_v9 = vadd.f32 %v717_v7, %v3932_v40  ;;  %v526_v10 = vpop.f32.mrb[38].mxu0  ;;  %v719_v11 = vpop.f32.mrb[38].mxu1  ;;  %1335 = vmatprep.mubr.bf16.mxu0 %v945_v60  ;;  %1496 = vmatprep.mubr.bf16.mxu1 %v947_v61 }
 0x13a   :  { %v858_v12 = vmax.f32 %v716_v5, 0.0  ;;  %v527_v13 = vadd.f32 %v526_v10, %v3926_v37  ;;  %v720_v14 = vadd.f32 %v719_v11, %v3928_v38  ;;  %v528_v15 = vpop.f32.mrb[39].mxu0  ;;  %v721_v16 = vpop.f32.mrb[39].mxu1  ;;  %1336 = vmatmul.mubr.bf16.gmra.mrb[96].mxu0 %v944_v58  ;;  %1497 = vmatmul.mubr.bf16.gmra.mrb[96].mxu1 %v946_v59  ;;  %v856_v20 = vmax.f32 %v523_v3, 0.0 }
 0x13b   :  { %v859_v17 = vmax.f32 %v718_v9, 0.0  ;;  %v529_v18 = vadd.f32 %v528_v15, %v3930_v39  ;;  %v722_v19 = vadd.f32 %v721_v16, %v3932_v40  ;;  %v857_v23 = vmax.f32 %v525_v8, 0.0 }
 0x13c   :  { %v860_v21 = vmax.f32 %v527_v13, 0.0  ;;  %v862_v22 = vmax.f32 %v720_v14, 0.0 }
 0x13d   :  { %v861_v24 = vmax.f32 %v529_v18, 0.0  ;;  %v863_v25 = vmax.f32 %v722_v19, 0.0 }
 0x13e   :  { %v948_v26 = vpack.c.bf16 %v860_v21, %v856_v20  ;;  %v950_v27 = vpack.c.bf16 %v862_v22, %v858_v12 }
 0x13f   :  { %v949_v28 = vpack.c.bf16 %v861_v24, %v857_v23  ;;  %v951_v29 = vpack.c.bf16 %v863_v25, %v859_v17  ;;  %v532_v30 = vpop.f32.mrb[40].mxu0  ;;  %v725_v31 = vpop.f32.mrb[40].mxu1 }
 0x140   :  { %v533_v32 = vadd.f32 %v532_v30, %v3926_v37  ;;  %v726_v33 = vadd.f32 %v725_v31, %v3928_v38  ;;  %v534_v34 = vpop.f32.mrb[41].mxu0  ;;  %v727_v35 = vpop.f32.mrb[41].mxu1 }
 0x141   :  { %v535_v1 = vadd.f32 %v534_v34, %v3930_v39  ;;  %v728_v36 = vadd.f32 %v727_v35, %v3932_v40  ;;  %v536_v41 = vpop.f32.mrb[42].mxu0  ;;  %v729_v42 = vpop.f32.mrb[42].mxu1  ;;  %1343 = vmatprep.mubr.bf16.mxu0 %v949_v28  ;;  %1504 = vmatprep.mubr.bf16.mxu1 %v951_v29 }
 0x142   :  { %v866_v4 = vmax.f32 %v726_v33, 0.0  ;;  %v537_v43 = vadd.f32 %v536_v41, %v3926_v37  ;;  %v730_v44 = vadd.f32 %v729_v42, %v3928_v38  ;;  %v538_v45 = vpop.f32.mrb[43].mxu0  ;;  %v731_v46 = vpop.f32.mrb[43].mxu1  ;;  %1344 = vmatmul.mubr.bf16.gmra.mrb[100].mxu0 %v948_v26  ;;  %1505 = vmatmul.mubr.bf16.gmra.mrb[100].mxu1 %v950_v27  ;;  %v864_v49 = vmax.f32 %v533_v32, 0.0 }
 0x143   :  { %v867_v47 = vmax.f32 %v728_v36, 0.0  ;;  %v539_v2 = vadd.f32 %v538_v45, %v3930_v39  ;;  %v732_v48 = vadd.f32 %v731_v46, %v3932_v40  ;;  %v865_v52 = vmax.f32 %v535_v1, 0.0 }
 0x144   :  { %v868_v50 = vmax.f32 %v537_v43, 0.0  ;;  %v870_v51 = vmax.f32 %v730_v44, 0.0 }
 0x145   :  { %v869_v53 = vmax.f32 %v539_v2, 0.0  ;;  %v871_v54 = vmax.f32 %v732_v48, 0.0 }
 0x146   :  { %v952_v55 = vpack.c.bf16 %v868_v50, %v864_v49  ;;  %v954_v56 = vpack.c.bf16 %v870_v51, %v866_v4 }
 0x147   :  { %v953_v57 = vpack.c.bf16 %v869_v53, %v865_v52  ;;  %v955_v58 = vpack.c.bf16 %v871_v54, %v867_v47  ;;  %v542_v59 = vpop.f32.mrb[44].mxu0  ;;  %v735_v60 = vpop.f32.mrb[44].mxu1 }
 0x148   :  { %v543_v61 = vadd.f32 %v542_v59, %v3926_v37  ;;  %v736_v62 = vadd.f32 %v735_v60, %v3928_v38  ;;  %v544_v63 = vpop.f32.mrb[45].mxu0  ;;  %v737_v3 = vpop.f32.mrb[45].mxu1 }
 0x149   :  { %v545_v5 = vadd.f32 %v544_v63, %v3930_v39  ;;  %v738_v6 = vadd.f32 %v737_v3, %v3932_v40  ;;  %v546_v7 = vpop.f32.mrb[46].mxu0  ;;  %v739_v8 = vpop.f32.mrb[46].mxu1  ;;  %1351 = vmatprep.mubr.bf16.mxu0 %v953_v57  ;;  %1512 = vmatprep.mubr.bf16.mxu1 %v955_v58  ;;  %v3435_v58 = vld [vmem:[%s4420_s6 + $0x38] sm:$0xff]  }
 0x14a   :  { %v874_v9 = vmax.f32 %v736_v62, 0.0  ;;  %v547_v10 = vadd.f32 %v546_v7, %v3926_v37  ;;  %v740_v11 = vadd.f32 %v739_v8, %v3928_v38  ;;  %v548_v12 = vpop.f32.mrb[47].mxu0  ;;  %v741_v13 = vpop.f32.mrb[47].mxu1  ;;  %1352 = vmatmul.mubr.bf16.gmra.mrb[104].mxu0 %v952_v55  ;;  %1513 = vmatmul.mubr.bf16.gmra.mrb[104].mxu1 %v954_v56  ;;  %v872_v17 = vmax.f32 %v543_v61, 0.0 }
 0x14b   :  { %v875_v14 = vmax.f32 %v738_v6, 0.0  ;;  %v549_v15 = vadd.f32 %v548_v12, %v3930_v39  ;;  %v742_v16 = vadd.f32 %v741_v13, %v3932_v40  ;;  %v873_v20 = vmax.f32 %v545_v5, 0.0  ;;  %3301 = vmatprep.subr.bf16.mxu0 %v3435_v58 }
 0x14c   :  { %v876_v18 = vmax.f32 %v547_v10, 0.0  ;;  %v878_v19 = vmax.f32 %v740_v11, 0.0  ;;  %3302 = vmatpush3.bf16.msra.mxu0 %v3435_v58 }
 0x14d   :  { %v877_v21 = vmax.f32 %v549_v15, 0.0  ;;  %v879_v22 = vmax.f32 %v742_v16, 0.0 }
 0x14e   :  { %v956_v23 = vpack.c.bf16 %v876_v18, %v872_v17  ;;  %v958_v24 = vpack.c.bf16 %v878_v19, %v874_v9 }
 0x14f   :  { %v957_v25 = vpack.c.bf16 %v877_v21, %v873_v20  ;;  %v959_v26 = vpack.c.bf16 %v879_v22, %v875_v14  ;;  %v552_v27 = vpop.f32.mrb[48].mxu0  ;;  %v745_v28 = vpop.f32.mrb[48].mxu1 }
 0x150   :  { %v553_v29 = vadd.f32 %v552_v27, %v3926_v37  ;;  %v746_v30 = vadd.f32 %v745_v28, %v3928_v38  ;;  %v554_v31 = vpop.f32.mrb[49].mxu0  ;;  %v747_v32 = vpop.f32.mrb[49].mxu1 }
 0x151   :  { %v555_v33 = vadd.f32 %v554_v31, %v3930_v39  ;;  %v748_v34 = vadd.f32 %v747_v32, %v3932_v40  ;;  %v556_v35 = vpop.f32.mrb[50].mxu0  ;;  %v749_v1 = vpop.f32.mrb[50].mxu1  ;;  %1359 = vmatprep.mubr.bf16.mxu0 %v957_v25  ;;  %1520 = vmatprep.mubr.bf16.mxu1 %v959_v26 }
 0x152   :  { %v882_v36 = vmax.f32 %v746_v30, 0.0  ;;  %v557_v41 = vadd.f32 %v556_v35, %v3926_v37  ;;  %v750_v42 = vadd.f32 %v749_v1, %v3928_v38  ;;  %v558_v4 = vpop.f32.mrb[51].mxu0  ;;  %v751_v43 = vpop.f32.mrb[51].mxu1  ;;  %1360 = vmatmul.mubr.bf16.gmra.mrb[108].mxu0 %v956_v23  ;;  %1521 = vmatmul.mubr.bf16.gmra.mrb[108].mxu1 %v958_v24  ;;  %v880_v47 = vmax.f32 %v553_v29, 0.0 }
 0x153   :  { %v883_v44 = vmax.f32 %v748_v34, 0.0  ;;  %v559_v45 = vadd.f32 %v558_v4, %v3930_v39  ;;  %v752_v46 = vadd.f32 %v751_v43, %v3932_v40  ;;  %v881_v49 = vmax.f32 %v555_v33, 0.0 }
 0x154   :  { %v884_v2 = vmax.f32 %v557_v41, 0.0  ;;  %v886_v48 = vmax.f32 %v750_v42, 0.0 }
 0x155   :  { %v885_v50 = vmax.f32 %v559_v45, 0.0  ;;  %v887_v51 = vmax.f32 %v752_v46, 0.0 }
 0x156   :  { %v960_v52 = vpack.c.bf16 %v884_v2, %v880_v47  ;;  %v962_v53 = vpack.c.bf16 %v886_v48, %v882_v36 }
 0x157   :  { %v961_v54 = vpack.c.bf16 %v885_v50, %v881_v49  ;;  %v963_v55 = vpack.c.bf16 %v887_v51, %v883_v44  ;;  %v562_v56 = vpop.f32.mrb[52].mxu0  ;;  %v755_v57 = vpop.f32.mrb[52].mxu1 }
 0x158   :  { %v563_v59 = vadd.f32 %v562_v56, %v3926_v37  ;;  %v756_v60 = vadd.f32 %v755_v57, %v3928_v38  ;;  %v564_v61 = vpop.f32.mrb[53].mxu0  ;;  %v757_v62 = vpop.f32.mrb[53].mxu1 }
 0x159   :  { %v565_v63 = vadd.f32 %v564_v61, %v3930_v39  ;;  %v758_v3 = vadd.f32 %v757_v62, %v3932_v40  ;;  %v566_v5 = vpop.f32.mrb[54].mxu0  ;;  %v759_v6 = vpop.f32.mrb[54].mxu1  ;;  %1367 = vmatprep.mubr.bf16.mxu0 %v961_v54  ;;  %1528 = vmatprep.mubr.bf16.mxu1 %v963_v55 }
 0x15a   :  { %v890_v7 = vmax.f32 %v756_v60, 0.0  ;;  %v567_v8 = vadd.f32 %v566_v5, %v3926_v37  ;;  %v760_v9 = vadd.f32 %v759_v6, %v3928_v38  ;;  %v568_v10 = vpop.f32.mrb[55].mxu0  ;;  %v761_v11 = vpop.f32.mrb[55].mxu1  ;;  %1368 = vmatmul.mubr.bf16.gmra.mrb[112].mxu0 %v960_v52  ;;  %1529 = vmatmul.mubr.bf16.gmra.mrb[112].mxu1 %v962_v53  ;;  %v888_v15 = vmax.f32 %v563_v59, 0.0 }
 0x15b   :  { %v891_v12 = vmax.f32 %v758_v3, 0.0  ;;  %v569_v13 = vadd.f32 %v568_v10, %v3930_v39  ;;  %v762_v14 = vadd.f32 %v761_v11, %v3932_v40  ;;  %v889_v18 = vmax.f32 %v565_v63, 0.0 }
 0x15c   :  { %v892_v16 = vmax.f32 %v567_v8, 0.0  ;;  %v894_v17 = vmax.f32 %v760_v9, 0.0 }
 0x15d   :  { %v893_v19 = vmax.f32 %v569_v13, 0.0  ;;  %v895_v20 = vmax.f32 %v762_v14, 0.0 }
 0x15e   :  { %v964_v21 = vpack.c.bf16 %v892_v16, %v888_v15  ;;  %v966_v22 = vpack.c.bf16 %v894_v17, %v890_v7 }
 0x15f   :  { %v965_v23 = vpack.c.bf16 %v893_v19, %v889_v18  ;;  %v967_v24 = vpack.c.bf16 %v895_v20, %v891_v12  ;;  %v572_v25 = vpop.f32.mrb[56].mxu0  ;;  %v765_v26 = vpop.f32.mrb[56].mxu1 }
 0x160   :  { %v573_v27 = vadd.f32 %v572_v25, %v3926_v37  ;;  %v766_v28 = vadd.f32 %v765_v26, %v3928_v38  ;;  %v574_v29 = vpop.f32.mrb[57].mxu0  ;;  %v767_v30 = vpop.f32.mrb[57].mxu1 }
 0x161   :  { %v575_v31 = vadd.f32 %v574_v29, %v3930_v39  ;;  %v768_v32 = vadd.f32 %v767_v30, %v3932_v40  ;;  %v576_v33 = vpop.f32.mrb[58].mxu0  ;;  %v769_v34 = vpop.f32.mrb[58].mxu1  ;;  %1375 = vmatprep.mubr.bf16.mxu0 %v965_v23  ;;  %1536 = vmatprep.mubr.bf16.mxu1 %v967_v24 }
 0x162   :  { %v898_v35 = vmax.f32 %v766_v28, 0.0  ;;  %v577_v1 = vadd.f32 %v576_v33, %v3926_v37  ;;  %v770_v36 = vadd.f32 %v769_v34, %v3928_v38  ;;  %v578_v41 = vpop.f32.mrb[59].mxu0  ;;  %v771_v42 = vpop.f32.mrb[59].mxu1  ;;  %1376 = vmatmul.mubr.bf16.gmra.mrb[116].mxu0 %v964_v21  ;;  %1537 = vmatmul.mubr.bf16.gmra.mrb[116].mxu1 %v966_v22  ;;  %v896_v45 = vmax.f32 %v573_v27, 0.0  ;;  %v4089_v21 = vld [vmem:[%s4419_s5] ss:$0 sm:$0xff] }
 0x163   :  { %v899_v4 = vmax.f32 %v768_v32, 0.0  ;;  %v579_v43 = vadd.f32 %v578_v41, %v3930_v39  ;;  %v772_v44 = vadd.f32 %v771_v42, %v3932_v40  ;;  %v897_v2 = vmax.f32 %v575_v31, 0.0  ;;  %v3437_v28 = vld [vmem:[%s4422_s8 + $0x8] sm:$0xff]  }
 0x164   :  { %v900_v46 = vmax.f32 %v577_v1, 0.0  ;;  %v902_v47 = vmax.f32 %v770_v36, 0.0  ;;  %v3438_v1 = vld [vmem:[%s4422_s8 + $0x10] sm:$0xff]   ;;  %v3439_v36 = vld [vmem:[%s4422_s8 + $0x18] sm:$0xff]  }
 0x165   :  { %v901_v48 = vmax.f32 %v579_v43, 0.0  ;;  %v903_v49 = vmax.f32 %v772_v44, 0.0 }
 0x166   :  { %v968_v50 = vpack.c.bf16 %v900_v46, %v896_v45  ;;  %v970_v51 = vpack.c.bf16 %v902_v47, %v898_v35 }
 0x167   :  { %v969_v52 = vpack.c.bf16 %v901_v48, %v897_v2  ;;  %v971_v53 = vpack.c.bf16 %v903_v49, %v899_v4  ;;  %v582_v54 = vpop.f32.mrb[60].mxu0  ;;  %v775_v55 = vpop.f32.mrb[60].mxu1 }
 0x168   :  { %v583_v56 = vadd.f32 %v582_v54, %v3926_v37  ;;  %v776_v57 = vadd.f32 %v775_v55, %v3928_v38  ;;  %v584_v58 = vpop.f32.mrb[61].mxu0  ;;  %v777_v59 = vpop.f32.mrb[61].mxu1 }
 0x169   :  { %v585_v60 = vadd.f32 %v584_v58, %v3930_v39  ;;  %v778_v61 = vadd.f32 %v777_v59, %v3932_v40  ;;  %v586_v62 = vpop.f32.mrb[62].mxu0  ;;  %v779_v63 = vpop.f32.mrb[62].mxu1  ;;  %1383 = vmatprep.mubr.bf16.mxu0 %v969_v52  ;;  %1544 = vmatprep.mubr.bf16.mxu1 %v971_v53  ;;  %v3441_v59 = vld [vmem:[%s4422_s8 + $0x28] sm:$0xff]  }
 0x16a   :  { %v906_v3 = vmax.f32 %v776_v57, 0.0  ;;  %v587_v5 = vadd.f32 %v586_v62, %v3926_v37  ;;  %v780_v6 = vadd.f32 %v779_v63, %v3928_v38  ;;  %v588_v7 = vpop.f32.mrb[63].mxu0  ;;  %v781_v8 = vpop.f32.mrb[63].mxu1  ;;  %1384 = vmatmul.mubr.bf16.gmra.mrb[120].mxu0 %v968_v50  ;;  %1545 = vmatmul.mubr.bf16.gmra.mrb[120].mxu1 %v970_v51  ;;  %v904_v12 = vmax.f32 %v583_v56, 0.0  ;;  %v3436_v38 = vld [vmem:[%s4422_s8] sm:$0xff]  }
 0x16b   :  { %v907_v9 = vmax.f32 %v778_v61, 0.0  ;;  %v589_v10 = vadd.f32 %v588_v7, %v3930_v39  ;;  %v782_v11 = vadd.f32 %v781_v8, %v3932_v40  ;;  %v905_v15 = vmax.f32 %v585_v60, 0.0  ;;  %3335 = vmatprep.subr.bf16.mxu1 %v3436_v38  ;;  %v3440_v50 = vld [vmem:[%s4422_s8 + $0x20] sm:$0xff]  }
 0x16c   :  { %v908_v13 = vmax.f32 %v587_v5, 0.0  ;;  %v910_v14 = vmax.f32 %v780_v6, 0.0  ;;  %3336 = vmatpush3.bf16.msra.mxu1 %v3436_v38 }
 0x16d   :  { %v909_v16 = vmax.f32 %v589_v10, 0.0  ;;  %v911_v17 = vmax.f32 %v782_v11, 0.0  ;;  %3337 = vmatprep.subr.bf16.mxu1 %v3437_v28  ;;  %v3442_v11 = vld [vmem:[%s4422_s8 + $0x30] sm:$0xff]  }
 0x16e   :  { %v972_v18 = vpack.c.bf16 %v908_v13, %v904_v12  ;;  %v974_v19 = vpack.c.bf16 %v910_v14, %v906_v3 }
 0x16f   :  { %v973_v37 = vpack.c.bf16 %v909_v16, %v905_v15  ;;  %v975_v20 = vpack.c.bf16 %v911_v17, %v907_v9 }
 0x170   :  { %3338 = vmatpush3.bf16.msra.mxu1 %v3437_v28 }
 0x171   :  { %1391 = vmatprep.mubr.bf16.mxu0 %v973_v37  ;;  %1552 = vmatprep.mubr.bf16.mxu1 %v975_v20  ;;  %v3443_v37 = vld [vmem:[%s4422_s8 + $0x38] sm:$0xff]  }
 0x172   :  { %1392 = vmatmul.mubr.bf16.gmra.mrb[124].mxu0 %v972_v18  ;;  %1553 = vmatmul.mubr.bf16.gmra.mrb[124].mxu1 %v974_v19 }
 0x173   :  { %3339 = vmatprep.subr.bf16.mxu1 %v3438_v1 }
 0x174   :  { %3340 = vmatpush3.bf16.msra.mxu1 %v3438_v1 }
 0x175   :  { %3341 = vmatprep.subr.bf16.mxu1 %v3439_v36 }
 0x178   :  { %3342 = vmatpush3.bf16.msra.mxu1 %v3439_v36 }
 0x179   :  { %3343 = vmatprep.subr.bf16.mxu1 %v3440_v50 }
 0x17c   :  { %3344 = vmatpush3.bf16.msra.mxu1 %v3440_v50 }
 0x17d   :  { %3345 = vmatprep.subr.bf16.mxu1 %v3441_v59 }
 0x180   :  { %3346 = vmatpush3.bf16.msra.mxu1 %v3441_v59 }
 0x181   :  { %3347 = vmatprep.subr.bf16.mxu1 %v3442_v11 }
 0x184   :  { %3348 = vmatpush3.bf16.msra.mxu1 %v3442_v11 }
 0x185   :  { %3349 = vmatprep.subr.bf16.mxu1 %v3443_v37 }
 0x188   :  { %3350 = vmatpush3.bf16.msra.mxu1 %v3443_v37 }
 0x1cd   :  { %v3031_v39 = vpop.f32.mrb[64].mxu0  ;;  %v3143_v40 = vpop.f32.mrb[64].mxu1 }
 0x1ce   :  { %v3032_v22 = vpop.f32.mrb[65].mxu0  ;;  %v3144_v23 = vpop.f32.mrb[65].mxu1 }
 0x1cf   :  { %v3033_v24 = vadd.f32 %v3032_v22, %v3031_v39  ;;  %v3145_v25 = vadd.f32 %v3144_v23, %v3143_v40  ;;  %v3034_v26 = vpop.f32.mrb[66].mxu0  ;;  %v3146_v27 = vpop.f32.mrb[66].mxu1 }
 0x1d0   :  { %v3035_v29 = vpop.f32.mrb[67].mxu0  ;;  %v3147_v30 = vpop.f32.mrb[67].mxu1 }
 0x1d1   :  { %v1274_v31 = vadd.f32 %v3033_v24, %v4089_v21  ;;  %v3036_v32 = vadd.f32 %v3035_v29, %v3034_v26  ;;  %v3148_v33 = vadd.f32 %v3147_v30, %v3146_v27 }
 0x1d3   :  { %v1435_v34 = vadd.f32 %v3145_v25, %v1274_v31  ;;  %v1277_v35 = vadd.f32 %v3036_v32, %v4089_v21 }
 0x1d5   :  { %v1438_v41 = vadd.f32 %v3148_v33, %v1277_v35  ;;  %v3037_v42 = vpop.f32.mrb[68].mxu0  ;;  %v3149_v4 = vpop.f32.mrb[68].mxu1  ;;  %v1561_v45 = vmax.f32 %v1435_v34, 0.0 }
 0x1d6   :  { %v3038_v43 = vpop.f32.mrb[69].mxu0  ;;  %v3150_v44 = vpop.f32.mrb[69].mxu1 }
 0x1d7   :  { %v1562_v46 = vmax.f32 %v1438_v41, 0.0  ;;  %v3039_v47 = vadd.f32 %v3038_v43, %v3037_v42  ;;  %v3151_v2 = vadd.f32 %v3150_v44, %v3149_v4  ;;  %v3040_v48 = vpop.f32.mrb[70].mxu0  ;;  %v3152_v49 = vpop.f32.mrb[70].mxu1 }
 0x1d8   :  { %v3041_v51 = vpop.f32.mrb[71].mxu0  ;;  %v3153_v52 = vpop.f32.mrb[71].mxu1 }
 0x1d9   :  { %v1282_v53 = vadd.f32 %v3039_v47, %v4089_v21  ;;  %v3042_v54 = vadd.f32 %v3041_v51, %v3040_v48  ;;  %v3154_v55 = vadd.f32 %v3153_v52, %v3152_v49  ;;  %v1593_v56 = vpack.c.bf16 %v1562_v46, %v1561_v45 }
 0x1db   :  { %v1443_v57 = vadd.f32 %v3151_v2, %v1282_v53  ;;  %v1285_v58 = vadd.f32 %v3042_v54, %v4089_v21  ;;  %3303 = vmatprep.mubr.bf16.mxu0 %v1593_v56 }
 0x1dd   :  { %v1446_v60 = vadd.f32 %v3154_v55, %v1285_v58  ;;  %v3043_v61 = vpop.f32.mrb[72].mxu0  ;;  %v3155_v62 = vpop.f32.mrb[72].mxu1  ;;  %v1563_v5 = vmax.f32 %v1443_v57, 0.0 }
 0x1de   :  { %v3044_v63 = vpop.f32.mrb[73].mxu0  ;;  %v3156_v3 = vpop.f32.mrb[73].mxu1 }
 0x1df   :  { %v1564_v6 = vmax.f32 %v1446_v60, 0.0  ;;  %v3045_v7 = vadd.f32 %v3044_v63, %v3043_v61  ;;  %v3157_v8 = vadd.f32 %v3156_v3, %v3155_v62  ;;  %v3046_v9 = vpop.f32.mrb[74].mxu0  ;;  %v3158_v10 = vpop.f32.mrb[74].mxu1 }
 0x1e0   :  { %v3047_v12 = vpop.f32.mrb[75].mxu0  ;;  %v3159_v13 = vpop.f32.mrb[75].mxu1 }
 0x1e1   :  { %v1594_v14 = vpack.c.bf16 %v1564_v6, %v1563_v5  ;;  %v1290_v15 = vadd.f32 %v3045_v7, %v4089_v21  ;;  %v3048_v16 = vadd.f32 %v3047_v12, %v3046_v9  ;;  %v3160_v17 = vadd.f32 %v3159_v13, %v3158_v10 }
 0x1e3   :  { %v1451_v18 = vadd.f32 %v3157_v8, %v1290_v15  ;;  %v1293_v19 = vadd.f32 %v3048_v16, %v4089_v21  ;;  %3304 = vmatmul.mubr.bf16.vlgmr.msra.gmra.mrb[128].mxu0 %v1594_v14 }
 0x1e5   :  { %v1454_v20 = vadd.f32 %v3160_v17, %v1293_v19  ;;  %v3049_v38 = vpop.f32.mrb[76].mxu0  ;;  %v3161_v39 = vpop.f32.mrb[76].mxu1  ;;  %v1565_v23 = vmax.f32 %v1451_v18, 0.0 }
 0x1e6   :  { %v3050_v40 = vpop.f32.mrb[77].mxu0  ;;  %v3162_v22 = vpop.f32.mrb[77].mxu1 }
 0x1e7   :  { %v1566_v24 = vmax.f32 %v1454_v20, 0.0  ;;  %v3051_v25 = vadd.f32 %v3050_v40, %v3049_v38  ;;  %v3163_v26 = vadd.f32 %v3162_v22, %v3161_v39  ;;  %v3052_v27 = vpop.f32.mrb[78].mxu0  ;;  %v3164_v28 = vpop.f32.mrb[78].mxu1 }
 0x1e8   :  { %v3053_v29 = vpop.f32.mrb[79].mxu0  ;;  %v3165_v30 = vpop.f32.mrb[79].mxu1 }
 0x1e9   :  { %v1298_v31 = vadd.f32 %v3051_v25, %v4089_v21  ;;  %v3054_v32 = vadd.f32 %v3053_v29, %v3052_v27  ;;  %v3166_v33 = vadd.f32 %v3165_v30, %v3164_v28  ;;  %v1595_v34 = vpack.c.bf16 %v1566_v24, %v1565_v23 }
 0x1eb   :  { %v1459_v35 = vadd.f32 %v3163_v26, %v1298_v31  ;;  %v1301_v1 = vadd.f32 %v3054_v32, %v4089_v21  ;;  %3307 = vmatprep.mubr.bf16.mxu0 %v1595_v34 }
 0x1ed   :  { %v1462_v36 = vadd.f32 %v3166_v33, %v1301_v1  ;;  %v3055_v41 = vpop.f32.mrb[80].mxu0  ;;  %v3167_v42 = vpop.f32.mrb[80].mxu1  ;;  %v1567_v44 = vmax.f32 %v1459_v35, 0.0 }
 0x1ee   :  { %v3056_v4 = vpop.f32.mrb[81].mxu0  ;;  %v3168_v43 = vpop.f32.mrb[81].mxu1 }
 0x1ef   :  { %v1568_v45 = vmax.f32 %v1462_v36, 0.0  ;;  %v3057_v46 = vadd.f32 %v3056_v4, %v3055_v41  ;;  %v3169_v47 = vadd.f32 %v3168_v43, %v3167_v42  ;;  %v3058_v2 = vpop.f32.mrb[82].mxu0  ;;  %v3170_v48 = vpop.f32.mrb[82].mxu1 }
 0x1f0   :  { %v3059_v49 = vpop.f32.mrb[83].mxu0  ;;  %v3171_v50 = vpop.f32.mrb[83].mxu1 }
 0x1f1   :  { %v1306_v51 = vadd.f32 %v3057_v46, %v4089_v21  ;;  %v3060_v52 = vadd.f32 %v3059_v49, %v3058_v2  ;;  %v3172_v53 = vadd.f32 %v3171_v50, %v3170_v48  ;;  %v1596_v54 = vpack.c.bf16 %v1568_v45, %v1567_v44 }
 0x1f3   :  { %v1467_v55 = vadd.f32 %v3169_v47, %v1306_v51  ;;  %v1309_v56 = vadd.f32 %v3060_v52, %v4089_v21  ;;  %3308 = vmatmul.mubr.bf16.gmra.mrb[132].mxu0 %v1596_v54 }
 0x1f5   :  { %v1470_v57 = vadd.f32 %v3172_v53, %v1309_v56  ;;  %v3061_v58 = vpop.f32.mrb[84].mxu0  ;;  %v3173_v59 = vpop.f32.mrb[84].mxu1  ;;  %v1569_v62 = vmax.f32 %v1467_v55, 0.0 }
 0x1f6   :  { %v3062_v60 = vpop.f32.mrb[85].mxu0  ;;  %v3174_v61 = vpop.f32.mrb[85].mxu1 }
 0x1f7   :  { %v1570_v63 = vmax.f32 %v1470_v57, 0.0  ;;  %v3063_v3 = vadd.f32 %v3062_v60, %v3061_v58  ;;  %v3175_v5 = vadd.f32 %v3174_v61, %v3173_v59  ;;  %v3064_v6 = vpop.f32.mrb[86].mxu0  ;;  %v3176_v7 = vpop.f32.mrb[86].mxu1 }
 0x1f8   :  { %v3065_v8 = vpop.f32.mrb[87].mxu0  ;;  %v3177_v9 = vpop.f32.mrb[87].mxu1 }
 0x1f9   :  { %v1314_v10 = vadd.f32 %v3063_v3, %v4089_v21  ;;  %v3066_v11 = vadd.f32 %v3065_v8, %v3064_v6  ;;  %v3178_v12 = vadd.f32 %v3177_v9, %v3176_v7  ;;  %v1597_v13 = vpack.c.bf16 %v1570_v63, %v1569_v62 }
 0x1fb   :  { %v1475_v14 = vadd.f32 %v3175_v5, %v1314_v10  ;;  %v1317_v15 = vadd.f32 %v3066_v11, %v4089_v21  ;;  %3311 = vmatprep.mubr.bf16.mxu0 %v1597_v13 }
 0x1fd   :  { %v1478_v16 = vadd.f32 %v3178_v12, %v1317_v15  ;;  %v3067_v17 = vpop.f32.mrb[88].mxu0  ;;  %v3179_v18 = vpop.f32.mrb[88].mxu1  ;;  %v1571_v20 = vmax.f32 %v1475_v14, 0.0 }
 0x1fe   :  { %v3068_v19 = vpop.f32.mrb[89].mxu0  ;;  %v3180_v37 = vpop.f32.mrb[89].mxu1 }
 0x1ff   :  { %v1572_v38 = vmax.f32 %v1478_v16, 0.0  ;;  %v3069_v39 = vadd.f32 %v3068_v19, %v3067_v17  ;;  %v3181_v40 = vadd.f32 %v3180_v37, %v3179_v18  ;;  %v3070_v22 = vpop.f32.mrb[90].mxu0  ;;  %v3182_v23 = vpop.f32.mrb[90].mxu1 }
 0x200   :  { %v3071_v24 = vpop.f32.mrb[91].mxu0  ;;  %v3183_v25 = vpop.f32.mrb[91].mxu1 }
 0x201   :  { %v1322_v26 = vadd.f32 %v3069_v39, %v4089_v21  ;;  %v3072_v27 = vadd.f32 %v3071_v24, %v3070_v22  ;;  %v3184_v28 = vadd.f32 %v3183_v25, %v3182_v23  ;;  %v1598_v29 = vpack.c.bf16 %v1572_v38, %v1571_v20 }
 0x203   :  { %v1483_v30 = vadd.f32 %v3181_v40, %v1322_v26  ;;  %v1325_v31 = vadd.f32 %v3072_v27, %v4089_v21  ;;  %3312 = vmatmul.mubr.bf16.gmra.mrb[136].mxu0 %v1598_v29 }
 0x205   :  { %v1486_v32 = vadd.f32 %v3184_v28, %v1325_v31  ;;  %v3073_v33 = vpop.f32.mrb[92].mxu0  ;;  %v3185_v34 = vpop.f32.mrb[92].mxu1  ;;  %v1573_v36 = vmax.f32 %v1483_v30, 0.0 }
 0x206   :  { %v3074_v35 = vpop.f32.mrb[93].mxu0  ;;  %v3186_v1 = vpop.f32.mrb[93].mxu1 }
 0x207   :  { %v1574_v41 = vmax.f32 %v1486_v32, 0.0  ;;  %v3075_v42 = vadd.f32 %v3074_v35, %v3073_v33  ;;  %v3187_v4 = vadd.f32 %v3186_v1, %v3185_v34  ;;  %v3076_v43 = vpop.f32.mrb[94].mxu0  ;;  %v3188_v44 = vpop.f32.mrb[94].mxu1 }
 0x208   :  { %v3077_v45 = vpop.f32.mrb[95].mxu0  ;;  %v3189_v46 = vpop.f32.mrb[95].mxu1 }
 0x209   :  { %v1330_v47 = vadd.f32 %v3075_v42, %v4089_v21  ;;  %v3078_v2 = vadd.f32 %v3077_v45, %v3076_v43  ;;  %v3190_v48 = vadd.f32 %v3189_v46, %v3188_v44  ;;  %v1599_v49 = vpack.c.bf16 %v1574_v41, %v1573_v36 }
 0x20b   :  { %v1491_v50 = vadd.f32 %v3187_v4, %v1330_v47  ;;  %v1333_v51 = vadd.f32 %v3078_v2, %v4089_v21  ;;  %3315 = vmatprep.mubr.bf16.mxu0 %v1599_v49 }
 0x20d   :  { %v1494_v52 = vadd.f32 %v3190_v48, %v1333_v51  ;;  %v3079_v53 = vpop.f32.mrb[96].mxu0  ;;  %v3191_v54 = vpop.f32.mrb[96].mxu1  ;;  %v1575_v57 = vmax.f32 %v1491_v50, 0.0 }
 0x20e   :  { %v3080_v55 = vpop.f32.mrb[97].mxu0  ;;  %v3192_v56 = vpop.f32.mrb[97].mxu1 }
 0x20f   :  { %v1576_v58 = vmax.f32 %v1494_v52, 0.0  ;;  %v3081_v59 = vadd.f32 %v3080_v55, %v3079_v53  ;;  %v3193_v60 = vadd.f32 %v3192_v56, %v3191_v54  ;;  %v3082_v61 = vpop.f32.mrb[98].mxu0  ;;  %v3194_v62 = vpop.f32.mrb[98].mxu1 }
 0x210   :  { %v3083_v63 = vpop.f32.mrb[99].mxu0  ;;  %v3195_v3 = vpop.f32.mrb[99].mxu1 }
 0x211   :  { %v1338_v5 = vadd.f32 %v3081_v59, %v4089_v21  ;;  %v3084_v6 = vadd.f32 %v3083_v63, %v3082_v61  ;;  %v3196_v7 = vadd.f32 %v3195_v3, %v3194_v62  ;;  %v1600_v8 = vpack.c.bf16 %v1576_v58, %v1575_v57 }
 0x213   :  { %v1499_v9 = vadd.f32 %v3193_v60, %v1338_v5  ;;  %v1341_v10 = vadd.f32 %v3084_v6, %v4089_v21  ;;  %3316 = vmatmul.mubr.bf16.gmra.mrb[140].mxu0 %v1600_v8 }
 0x215   :  { %v1502_v11 = vadd.f32 %v3196_v7, %v1341_v10  ;;  %v3085_v12 = vpop.f32.mrb[100].mxu0  ;;  %v3197_v13 = vpop.f32.mrb[100].mxu1  ;;  %v1577_v16 = vmax.f32 %v1499_v9, 0.0 }
 0x216   :  { %v3086_v14 = vpop.f32.mrb[101].mxu0  ;;  %v3198_v15 = vpop.f32.mrb[101].mxu1 }
 0x217   :  { %v1578_v17 = vmax.f32 %v1502_v11, 0.0  ;;  %v3087_v18 = vadd.f32 %v3086_v14, %v3085_v12  ;;  %v3199_v19 = vadd.f32 %v3198_v15, %v3197_v13  ;;  %v3088_v37 = vpop.f32.mrb[102].mxu0  ;;  %v3200_v20 = vpop.f32.mrb[102].mxu1 }
 0x218   :  { %v3089_v38 = vpop.f32.mrb[103].mxu0  ;;  %v3201_v39 = vpop.f32.mrb[103].mxu1 }
 0x219   :  { %v1346_v40 = vadd.f32 %v3087_v18, %v4089_v21  ;;  %v3090_v22 = vadd.f32 %v3089_v38, %v3088_v37  ;;  %v3202_v23 = vadd.f32 %v3201_v39, %v3200_v20  ;;  %v1601_v24 = vpack.c.bf16 %v1578_v17, %v1577_v16 }
 0x21b   :  { %v1507_v25 = vadd.f32 %v3199_v19, %v1346_v40  ;;  %v1349_v26 = vadd.f32 %v3090_v22, %v4089_v21  ;;  %3319 = vmatprep.mubr.bf16.mxu0 %v1601_v24 }
 0x21d   :  { %v1510_v27 = vadd.f32 %v3202_v23, %v1349_v26  ;;  %v3091_v28 = vpop.f32.mrb[104].mxu0  ;;  %v3203_v29 = vpop.f32.mrb[104].mxu1  ;;  %v1579_v32 = vmax.f32 %v1507_v25, 0.0 }
 0x21e   :  { %v3092_v30 = vpop.f32.mrb[105].mxu0  ;;  %v3204_v31 = vpop.f32.mrb[105].mxu1 }
 0x21f   :  { %v1580_v33 = vmax.f32 %v1510_v27, 0.0  ;;  %v3093_v34 = vadd.f32 %v3092_v30, %v3091_v28  ;;  %v3205_v35 = vadd.f32 %v3204_v31, %v3203_v29  ;;  %v3094_v1 = vpop.f32.mrb[106].mxu0  ;;  %v3206_v36 = vpop.f32.mrb[106].mxu1 }
 0x220   :  { %v3095_v41 = vpop.f32.mrb[107].mxu0  ;;  %v3207_v42 = vpop.f32.mrb[107].mxu1 }
 0x221   :  { %v1354_v4 = vadd.f32 %v3093_v34, %v4089_v21  ;;  %v3096_v43 = vadd.f32 %v3095_v41, %v3094_v1  ;;  %v3208_v44 = vadd.f32 %v3207_v42, %v3206_v36  ;;  %v1602_v45 = vpack.c.bf16 %v1580_v33, %v1579_v32 }
 0x223   :  { %v1515_v46 = vadd.f32 %v3205_v35, %v1354_v4  ;;  %v1357_v47 = vadd.f32 %v3096_v43, %v4089_v21  ;;  %3320 = vmatmul.mubr.bf16.gmra.mrb[144].mxu0 %v1602_v45 }
 0x225   :  { %v1518_v2 = vadd.f32 %v3208_v44, %v1357_v47  ;;  %v3097_v48 = vpop.f32.mrb[108].mxu0  ;;  %v3209_v49 = vpop.f32.mrb[108].mxu1  ;;  %v1581_v52 = vmax.f32 %v1515_v46, 0.0 }
 0x226   :  { %v3098_v50 = vpop.f32.mrb[109].mxu0  ;;  %v3210_v51 = vpop.f32.mrb[109].mxu1 }
 0x227   :  { %v1582_v53 = vmax.f32 %v1518_v2, 0.0  ;;  %v3099_v54 = vadd.f32 %v3098_v50, %v3097_v48  ;;  %v3211_v55 = vadd.f32 %v3210_v51, %v3209_v49  ;;  %v3100_v56 = vpop.f32.mrb[110].mxu0  ;;  %v3212_v57 = vpop.f32.mrb[110].mxu1 }
 0x228   :  { %v3101_v58 = vpop.f32.mrb[111].mxu0  ;;  %v3213_v59 = vpop.f32.mrb[111].mxu1 }
 0x229   :  { %v1362_v60 = vadd.f32 %v3099_v54, %v4089_v21  ;;  %v3102_v61 = vadd.f32 %v3101_v58, %v3100_v56  ;;  %v3214_v62 = vadd.f32 %v3213_v59, %v3212_v57  ;;  %v1603_v63 = vpack.c.bf16 %v1582_v53, %v1581_v52 }
 0x22b   :  { %v1523_v3 = vadd.f32 %v3211_v55, %v1362_v60  ;;  %v1365_v5 = vadd.f32 %v3102_v61, %v4089_v21  ;;  %3323 = vmatprep.mubr.bf16.mxu0 %v1603_v63 }
 0x22d   :  { %v1526_v6 = vadd.f32 %v3214_v62, %v1365_v5  ;;  %v3103_v7 = vpop.f32.mrb[112].mxu0  ;;  %v3215_v8 = vpop.f32.mrb[112].mxu1  ;;  %v1583_v11 = vmax.f32 %v1523_v3, 0.0 }
 0x22e   :  { %v3104_v9 = vpop.f32.mrb[113].mxu0  ;;  %v3216_v10 = vpop.f32.mrb[113].mxu1 }
 0x22f   :  { %v1584_v12 = vmax.f32 %v1526_v6, 0.0  ;;  %v3105_v13 = vadd.f32 %v3104_v9, %v3103_v7  ;;  %v3217_v14 = vadd.f32 %v3216_v10, %v3215_v8  ;;  %v3106_v15 = vpop.f32.mrb[114].mxu0  ;;  %v3218_v16 = vpop.f32.mrb[114].mxu1 }
 0x230   :  { %v3107_v17 = vpop.f32.mrb[115].mxu0  ;;  %v3219_v18 = vpop.f32.mrb[115].mxu1 }
 0x231   :  { %v1370_v19 = vadd.f32 %v3105_v13, %v4089_v21  ;;  %v3108_v37 = vadd.f32 %v3107_v17, %v3106_v15  ;;  %v3220_v20 = vadd.f32 %v3219_v18, %v3218_v16  ;;  %v1604_v38 = vpack.c.bf16 %v1584_v12, %v1583_v11 }
 0x233   :  { %v1531_v39 = vadd.f32 %v3217_v14, %v1370_v19  ;;  %v1373_v40 = vadd.f32 %v3108_v37, %v4089_v21  ;;  %3324 = vmatmul.mubr.bf16.gmra.mrb[148].mxu0 %v1604_v38 }
 0x235   :  { %v1534_v22 = vadd.f32 %v3220_v20, %v1373_v40  ;;  %v3109_v23 = vpop.f32.mrb[116].mxu0  ;;  %v3221_v24 = vpop.f32.mrb[116].mxu1  ;;  %v1585_v27 = vmax.f32 %v1531_v39, 0.0  ;;  %v4147_v40 = vld [vmem:[%s4421_s7] ss:$0 sm:$0xff] }
 0x236   :  { %v3110_v25 = vpop.f32.mrb[117].mxu0  ;;  %v3222_v26 = vpop.f32.mrb[117].mxu1 }
 0x237   :  { %v1586_v28 = vmax.f32 %v1534_v22, 0.0  ;;  %v3111_v29 = vadd.f32 %v3110_v25, %v3109_v23  ;;  %v3223_v30 = vadd.f32 %v3222_v26, %v3221_v24  ;;  %v3112_v31 = vpop.f32.mrb[118].mxu0  ;;  %v3224_v32 = vpop.f32.mrb[118].mxu1 }
 0x238   :  { %v3113_v33 = vpop.f32.mrb[119].mxu0  ;;  %v3225_v34 = vpop.f32.mrb[119].mxu1 }
 0x239   :  { %v1378_v35 = vadd.f32 %v3111_v29, %v4089_v21  ;;  %v3114_v1 = vadd.f32 %v3113_v33, %v3112_v31  ;;  %v3226_v36 = vadd.f32 %v3225_v34, %v3224_v32  ;;  %v1605_v41 = vpack.c.bf16 %v1586_v28, %v1585_v27 }
 0x23b   :  { %v1539_v42 = vadd.f32 %v3223_v30, %v1378_v35  ;;  %v1381_v4 = vadd.f32 %v3114_v1, %v4089_v21  ;;  %3327 = vmatprep.mubr.bf16.mxu0 %v1605_v41 }
 0x23d   :  { %v1542_v43 = vadd.f32 %v3226_v36, %v1381_v4  ;;  %v3115_v44 = vpop.f32.mrb[120].mxu0  ;;  %v3227_v45 = vpop.f32.mrb[120].mxu1  ;;  %v1587_v2 = vmax.f32 %v1539_v42, 0.0 }
 0x23e   :  { %v3116_v46 = vpop.f32.mrb[121].mxu0  ;;  %v3228_v47 = vpop.f32.mrb[121].mxu1 }
 0x23f   :  { %v1588_v48 = vmax.f32 %v1542_v43, 0.0  ;;  %v3117_v49 = vadd.f32 %v3116_v46, %v3115_v44  ;;  %v3229_v50 = vadd.f32 %v3228_v47, %v3227_v45  ;;  %v3118_v51 = vpop.f32.mrb[122].mxu0  ;;  %v3230_v52 = vpop.f32.mrb[122].mxu1 }
 0x240   :  { %v3119_v53 = vpop.f32.mrb[123].mxu0  ;;  %v3231_v54 = vpop.f32.mrb[123].mxu1 }
 0x241   :  { %v1386_v55 = vadd.f32 %v3117_v49, %v4089_v21  ;;  %v3120_v56 = vadd.f32 %v3119_v53, %v3118_v51  ;;  %v3232_v57 = vadd.f32 %v3231_v54, %v3230_v52  ;;  %v1606_v58 = vpack.c.bf16 %v1588_v48, %v1587_v2 }
 0x243   :  { %v1547_v59 = vadd.f32 %v3229_v50, %v1386_v55  ;;  %v1389_v60 = vadd.f32 %v3120_v56, %v4089_v21  ;;  %3328 = vmatmul.mubr.bf16.gmra.mrb[152].mxu0 %v1606_v58 }
 0x245   :  { %v1550_v61 = vadd.f32 %v3232_v57, %v1389_v60  ;;  %v3121_v62 = vpop.f32.mrb[124].mxu0  ;;  %v3233_v63 = vpop.f32.mrb[124].mxu1  ;;  %v1589_v6 = vmax.f32 %v1547_v59, 0.0 }
 0x246   :  { %v3122_v3 = vpop.f32.mrb[125].mxu0  ;;  %v3234_v5 = vpop.f32.mrb[125].mxu1 }
 0x247   :  { %v1590_v7 = vmax.f32 %v1550_v61, 0.0  ;;  %v3123_v8 = vadd.f32 %v3122_v3, %v3121_v62  ;;  %v3235_v9 = vadd.f32 %v3234_v5, %v3233_v63  ;;  %v3124_v10 = vpop.f32.mrb[126].mxu0  ;;  %v3236_v11 = vpop.f32.mrb[126].mxu1 }
 0x248   :  { %v3125_v12 = vpop.f32.mrb[127].mxu0  ;;  %v3237_v13 = vpop.f32.mrb[127].mxu1 }
 0x249   :  { %v1394_v14 = vadd.f32 %v3123_v8, %v4089_v21  ;;  %v3126_v15 = vadd.f32 %v3125_v12, %v3124_v10  ;;  %v3238_v16 = vadd.f32 %v3237_v13, %v3236_v11  ;;  %v1607_v17 = vpack.c.bf16 %v1590_v7, %v1589_v6 }
 0x24b   :  { %v1555_v18 = vadd.f32 %v3235_v9, %v1394_v14  ;;  %v1397_v19 = vadd.f32 %v3126_v15, %v4089_v21  ;;  %3331 = vmatprep.mubr.bf16.mxu0 %v1607_v17 }
 0x24d   :  { %v1558_v37 = vadd.f32 %v3238_v16, %v1397_v19  ;;  %v1591_v20 = vmax.f32 %v1555_v18, 0.0 }
 0x24f   :  { %v1592_v38 = vmax.f32 %v1558_v37, 0.0 }
 0x251   :  { %v1608_v39 = vpack.c.bf16 %v1592_v38, %v1591_v20 }
 0x253   :  { %3332 = vmatmul.mubr.bf16.gmra.mrb[156].mxu0 %v1608_v39 }
 0x2b6   :  { %v3305_v22 = vpop.f32.mrb[128].mxu0 }
 0x2b7   :  { %v1723_v23 = vadd.f32 %v3305_v22, %v4147_v40  ;;  %v1714_v24 = vpop.f32.mrb[129].mxu0 }
 0x2b8   :  { %v1715_v25 = vadd.f32 %v4147_v40, %v1714_v24  ;;  %v3306_v26 = vpop.f32.mrb[130].mxu0 }
 0x2b9   :  { %v1726_v21 = vadd.f32 %v3306_v26, %v4147_v40  ;;  %v1717_v27 = vpop.f32.mrb[131].mxu0  ;;  %v1843_v29 = vmax.f32 %v1723_v23, 0.0 }
 0x2ba   :  { %v1718_v28 = vadd.f32 %v4147_v40, %v1717_v27  ;;  %v1841_v31 = vmax.f32 %v1715_v25, 0.0 }
 0x2bb   :  { %v1844_v30 = vmax.f32 %v1726_v21, 0.0 }
 0x2bc   :  { %v1842_v32 = vmax.f32 %v1718_v28, 0.0 }
 0x2bd   :  { %v1874_v33 = vpack.c.bf16 %v1844_v30, %v1843_v29 }
 0x2be   :  { %v1873_v34 = vpack.c.bf16 %v1842_v32, %v1841_v31 }
 0x2c0   :  { %3351 = vmatprep.mubr.bf16.mxu1 %v1873_v34 }
 0x2c1   :  { %3352 = vmatmul.mubr.bf16.vlgmr.msra.gmra.mrb[128].mxu1 %v1874_v33 }
 0x2c6   :  { %v3309_v35 = vpop.f32.mrb[132].mxu0 }
 0x2c7   :  { %v1739_v1 = vadd.f32 %v3309_v35, %v4147_v40  ;;  %v1730_v36 = vpop.f32.mrb[133].mxu0 }
 0x2c8   :  { %v1731_v41 = vadd.f32 %v4147_v40, %v1730_v36  ;;  %v3310_v42 = vpop.f32.mrb[134].mxu0 }
 0x2c9   :  { %v1742_v4 = vadd.f32 %v3310_v42, %v4147_v40  ;;  %v1733_v43 = vpop.f32.mrb[135].mxu0  ;;  %v1847_v45 = vmax.f32 %v1739_v1, 0.0 }
 0x2ca   :  { %v1734_v44 = vadd.f32 %v4147_v40, %v1733_v43  ;;  %v1845_v47 = vmax.f32 %v1731_v41, 0.0 }
 0x2cb   :  { %v1848_v46 = vmax.f32 %v1742_v4, 0.0 }
 0x2cc   :  { %v1846_v2 = vmax.f32 %v1734_v44, 0.0 }
 0x2cd   :  { %v1876_v48 = vpack.c.bf16 %v1848_v46, %v1847_v45 }
 0x2ce   :  { %v1875_v49 = vpack.c.bf16 %v1846_v2, %v1845_v47 }
 0x2d0   :  { %3355 = vmatprep.mubr.bf16.mxu1 %v1875_v49 }
 0x2d1   :  { %3356 = vmatmul.mubr.bf16.gmra.mrb[132].mxu1 %v1876_v48 }
 0x2d6   :  { %v3313_v50 = vpop.f32.mrb[136].mxu0 }
 0x2d7   :  { %v1755_v51 = vadd.f32 %v3313_v50, %v4147_v40  ;;  %v1746_v52 = vpop.f32.mrb[137].mxu0 }
 0x2d8   :  { %v1747_v53 = vadd.f32 %v4147_v40, %v1746_v52  ;;  %v3314_v54 = vpop.f32.mrb[138].mxu0 }
 0x2d9   :  { %v1758_v55 = vadd.f32 %v3314_v54, %v4147_v40  ;;  %v1749_v56 = vpop.f32.mrb[139].mxu0  ;;  %v1851_v58 = vmax.f32 %v1755_v51, 0.0 }
 0x2da   :  { %v1750_v57 = vadd.f32 %v4147_v40, %v1749_v56  ;;  %v1849_v60 = vmax.f32 %v1747_v53, 0.0 }
 0x2db   :  { %v1852_v59 = vmax.f32 %v1758_v55, 0.0 }
 0x2dc   :  { %v1850_v61 = vmax.f32 %v1750_v57, 0.0 }
 0x2dd   :  { %v1878_v62 = vpack.c.bf16 %v1852_v59, %v1851_v58 }
 0x2de   :  { %v1877_v63 = vpack.c.bf16 %v1850_v61, %v1849_v60 }
 0x2e0   :  { %3359 = vmatprep.mubr.bf16.mxu1 %v1877_v63 }
 0x2e1   :  { %3360 = vmatmul.mubr.bf16.gmra.mrb[136].mxu1 %v1878_v62 }
 0x2e6   :  { %v3317_v3 = vpop.f32.mrb[140].mxu0 }
 0x2e7   :  { %v1771_v5 = vadd.f32 %v3317_v3, %v4147_v40  ;;  %v1762_v6 = vpop.f32.mrb[141].mxu0 }
 0x2e8   :  { %v1763_v7 = vadd.f32 %v4147_v40, %v1762_v6  ;;  %v3318_v8 = vpop.f32.mrb[142].mxu0 }
 0x2e9   :  { %v1774_v9 = vadd.f32 %v3318_v8, %v4147_v40  ;;  %v1765_v10 = vpop.f32.mrb[143].mxu0  ;;  %v1855_v12 = vmax.f32 %v1771_v5, 0.0 }
 0x2ea   :  { %v1766_v11 = vadd.f32 %v4147_v40, %v1765_v10  ;;  %v1853_v14 = vmax.f32 %v1763_v7, 0.0 }
 0x2eb   :  { %v1856_v13 = vmax.f32 %v1774_v9, 0.0 }
 0x2ec   :  { %v1854_v15 = vmax.f32 %v1766_v11, 0.0 }
 0x2ed   :  { %v1880_v16 = vpack.c.bf16 %v1856_v13, %v1855_v12  ;;  %v4184_v12 = vld [vmem:[%s4423_s9] ss:$0 sm:$0xff] }
 0x2ee   :  { %v1879_v17 = vpack.c.bf16 %v1854_v15, %v1853_v14 }
 0x2f0   :  { %3363 = vmatprep.mubr.bf16.mxu1 %v1879_v17 }
 0x2f1   :  { %3364 = vmatmul.mubr.bf16.gmra.mrb[140].mxu1 %v1880_v16 }
 0x2f6   :  { %v3321_v18 = vpop.f32.mrb[144].mxu0 }
 0x2f7   :  { %v1787_v19 = vadd.f32 %v3321_v18, %v4147_v40  ;;  %v1778_v37 = vpop.f32.mrb[145].mxu0 }
 0x2f8   :  { %v1779_v20 = vadd.f32 %v4147_v40, %v1778_v37  ;;  %v3322_v38 = vpop.f32.mrb[146].mxu0 }
 0x2f9   :  { %v1790_v39 = vadd.f32 %v3322_v38, %v4147_v40  ;;  %v1781_v22 = vpop.f32.mrb[147].mxu0  ;;  %v1859_v24 = vmax.f32 %v1787_v19, 0.0 }
 0x2fa   :  { %v1782_v23 = vadd.f32 %v4147_v40, %v1781_v22  ;;  %v1857_v26 = vmax.f32 %v1779_v20, 0.0 }
 0x2fb   :  { %v1860_v25 = vmax.f32 %v1790_v39, 0.0 }
 0x2fc   :  { %v1858_v21 = vmax.f32 %v1782_v23, 0.0 }
 0x2fd   :  { %v1882_v27 = vpack.c.bf16 %v1860_v25, %v1859_v24 }
 0x2fe   :  { %v1881_v28 = vpack.c.bf16 %v1858_v21, %v1857_v26 }
 0x300   :  { %3367 = vmatprep.mubr.bf16.mxu1 %v1881_v28 }
 0x301   :  { %3368 = vmatmul.mubr.bf16.gmra.mrb[144].mxu1 %v1882_v27 }
 0x306   :  { %v3325_v29 = vpop.f32.mrb[148].mxu0 }
 0x307   :  { %v1803_v30 = vadd.f32 %v3325_v29, %v4147_v40  ;;  %v1794_v31 = vpop.f32.mrb[149].mxu0 }
 0x308   :  { %v1795_v32 = vadd.f32 %v4147_v40, %v1794_v31  ;;  %v3326_v33 = vpop.f32.mrb[150].mxu0 }
 0x309   :  { %v1806_v34 = vadd.f32 %v3326_v33, %v4147_v40  ;;  %v1797_v35 = vpop.f32.mrb[151].mxu0  ;;  %v1863_v36 = vmax.f32 %v1803_v30, 0.0 }
 0x30a   :  { %v1798_v1 = vadd.f32 %v4147_v40, %v1797_v35  ;;  %v1861_v42 = vmax.f32 %v1795_v32, 0.0 }
 0x30b   :  { %v1864_v41 = vmax.f32 %v1806_v34, 0.0 }
 0x30c   :  { %v1862_v4 = vmax.f32 %v1798_v1, 0.0 }
 0x30d   :  { %v1884_v43 = vpack.c.bf16 %v1864_v41, %v1863_v36 }
 0x30e   :  { %v1883_v44 = vpack.c.bf16 %v1862_v4, %v1861_v42 }
 0x310   :  { %3371 = vmatprep.mubr.bf16.mxu1 %v1883_v44 }
 0x311   :  { %3372 = vmatmul.mubr.bf16.gmra.mrb[148].mxu1 %v1884_v43 }
 0x316   :  { %v3329_v45 = vpop.f32.mrb[152].mxu0 }
 0x317   :  { %v1819_v46 = vadd.f32 %v3329_v45, %v4147_v40  ;;  %v1810_v47 = vpop.f32.mrb[153].mxu0 }
 0x318   :  { %v1811_v2 = vadd.f32 %v4147_v40, %v1810_v47  ;;  %v3330_v48 = vpop.f32.mrb[154].mxu0 }
 0x319   :  { %v1822_v49 = vadd.f32 %v3330_v48, %v4147_v40  ;;  %v1813_v50 = vpop.f32.mrb[155].mxu0  ;;  %v1867_v52 = vmax.f32 %v1819_v46, 0.0 }
 0x31a   :  { %v1814_v51 = vadd.f32 %v4147_v40, %v1813_v50  ;;  %v1865_v54 = vmax.f32 %v1811_v2, 0.0 }
 0x31b   :  { %v1868_v53 = vmax.f32 %v1822_v49, 0.0 }
 0x31c   :  { %v1866_v55 = vmax.f32 %v1814_v51, 0.0 }
 0x31d   :  { %v1886_v56 = vpack.c.bf16 %v1868_v53, %v1867_v52 }
 0x31e   :  { %v1885_v57 = vpack.c.bf16 %v1866_v55, %v1865_v54 }
 0x320   :  { %3375 = vmatprep.mubr.bf16.mxu1 %v1885_v57 }
 0x321   :  { %3376 = vmatmul.mubr.bf16.gmra.mrb[152].mxu1 %v1886_v56 }
 0x326   :  { %v3333_v58 = vpop.f32.mrb[156].mxu0 }
 0x327   :  { %v1835_v59 = vadd.f32 %v3333_v58, %v4147_v40  ;;  %v1826_v60 = vpop.f32.mrb[157].mxu0 }
 0x328   :  { %v1827_v61 = vadd.f32 %v4147_v40, %v1826_v60  ;;  %v3334_v62 = vpop.f32.mrb[158].mxu0 }
 0x329   :  { %v1838_v63 = vadd.f32 %v3334_v62, %v4147_v40  ;;  %v1829_v3 = vpop.f32.mrb[159].mxu0  ;;  %v1871_v6 = vmax.f32 %v1835_v59, 0.0 }
 0x32a   :  { %v1830_v5 = vadd.f32 %v4147_v40, %v1829_v3  ;;  %v1869_v8 = vmax.f32 %v1827_v61, 0.0 }
 0x32b   :  { %v1872_v7 = vmax.f32 %v1838_v63, 0.0 }
 0x32c   :  { %v1870_v9 = vmax.f32 %v1830_v5, 0.0 }
 0x32d   :  { %v1888_v10 = vpack.c.bf16 %v1872_v7, %v1871_v6 }
 0x32e   :  { %v1887_v11 = vpack.c.bf16 %v1870_v9, %v1869_v8 }
 0x330   :  { %3379 = vmatprep.mubr.bf16.mxu1 %v1887_v11 }
 0x331   :  { %3380 = vmatmul.mubr.bf16.gmra.mrb[156].mxu1 %v1888_v10 }
 0x394   :  { %v3353_v13 = vpop.f32.mrb[128].mxu1 }
 0x395   :  { %v4187_v14 = vadd.f32 %v3353_v13, %v4184_v12  ;;  %v1994_v15 = vpop.f32.mrb[129].mxu1 }
 0x396   :  { %v4190_v40 = vadd.f32 %v4184_v12, %v1994_v15  ;;  %v3354_v16 = vpop.f32.mrb[130].mxu1 }
 0x397   :  { %2157 = vrot.lane.b32.xlu1 %v4187_v14, %s3600_s2  ;;  %v1997_v17 = vpop.f32.mrb[131].mxu1  ;;  %v4197_v18 = vadd.f32 %v3354_v16, %v4184_v12 }
 0x398   :  { %2153 = vrot.lane.b32.xlu0 %v4190_v40, %s3600_s2  ;;  %v4200_v19 = vadd.f32 %v4184_v12, %v1997_v17 }
 0x39b   :  { %2159 = vrot.lane.b32.xlu1 %v4197_v18, %s3600_s2 }
 0x39c   :  { %2155 = vrot.lane.b32.xlu0 %v4200_v19, %s3600_s2 }
 0x3a4   :  { %v3357_v37 = vpop.f32.mrb[132].mxu1 }
 0x3a5   :  { %v4207_v20 = vadd.f32 %v3357_v37, %v4184_v12  ;;  %v2010_v38 = vpop.f32.mrb[133].mxu1 }
 0x3a6   :  { %v3358_v39 = vpop.f32.mrb[134].mxu1  ;;  %v4215_v24 = vadd.f32 %v4184_v12, %v2010_v38 }
 0x3a7   :  { %v4210_v22 = vadd.f32 %v3358_v39, %v4184_v12  ;;  %v2013_v23 = vpop.f32.mrb[135].mxu1  ;;  %2165 = vrot.lane.b32.xlu0 %v4207_v20, %s3600_s2 }
 0x3a8   :  { %v4220_v25 = vadd.f32 %v4184_v12, %v2013_v23 }
 0x3a9   :  { %2167 = vrot.lane.b32.xlu1 %v4210_v22, %s3600_s2 }
 0x3ab   :  { %2161 = vrot.lane.b32.xlu0 %v4215_v24, %s3600_s2 }
 0x3ad   :  { %2163 = vrot.lane.b32.xlu1 %v4220_v25, %s3600_s2 }
 0x3b4   :  { %v3361_v26 = vpop.f32.mrb[136].mxu1 }
 0x3b5   :  { %v4227_v21 = vadd.f32 %v3361_v26, %v4184_v12  ;;  %v2026_v27 = vpop.f32.mrb[137].mxu1 }
 0x3b6   :  { %v3362_v28 = vpop.f32.mrb[138].mxu1  ;;  %v4235_v31 = vadd.f32 %v4184_v12, %v2026_v27 }
 0x3b7   :  { %v4230_v29 = vadd.f32 %v3362_v28, %v4184_v12  ;;  %v2029_v30 = vpop.f32.mrb[139].mxu1  ;;  %2173 = vrot.lane.b32.xlu0 %v4227_v21, %s3600_s2 }
 0x3b8   :  { %v4240_v32 = vadd.f32 %v4184_v12, %v2029_v30 }
 0x3b9   :  { %2175 = vrot.lane.b32.xlu1 %v4230_v29, %s3600_s2 }
 0x3bb   :  { %2169 = vrot.lane.b32.xlu0 %v4235_v31, %s3600_s2 }
 0x3bd   :  { %2171 = vrot.lane.b32.xlu1 %v4240_v32, %s3600_s2 }
 0x3c4   :  { %v3365_v33 = vpop.f32.mrb[140].mxu1 }
 0x3c5   :  { %v4247_v34 = vadd.f32 %v3365_v33, %v4184_v12  ;;  %v2042_v35 = vpop.f32.mrb[141].mxu1 }
 0x3c6   :  { %v3366_v1 = vpop.f32.mrb[142].mxu1  ;;  %v4255_v42 = vadd.f32 %v4184_v12, %v2042_v35 }
 0x3c7   :  { %v4250_v36 = vadd.f32 %v3366_v1, %v4184_v12  ;;  %v2045_v41 = vpop.f32.mrb[143].mxu1  ;;  %2181 = vrot.lane.b32.xlu0 %v4247_v34, %s3600_s2 }
 0x3c8   :  { %v4260_v4 = vadd.f32 %v4184_v12, %v2045_v41 }
 0x3c9   :  { %2183 = vrot.lane.b32.xlu1 %v4250_v36, %s3600_s2 }
 0x3cb   :  { %2177 = vrot.lane.b32.xlu0 %v4255_v42, %s3600_s2 }
 0x3cd   :  { %2179 = vrot.lane.b32.xlu1 %v4260_v4, %s3600_s2 }
 0x3d4   :  { %v3369_v43 = vpop.f32.mrb[144].mxu1 }
 0x3d5   :  { %v4267_v44 = vadd.f32 %v3369_v43, %v4184_v12  ;;  %v2058_v45 = vpop.f32.mrb[145].mxu1 }
 0x3d6   :  { %v3370_v46 = vpop.f32.mrb[146].mxu1  ;;  %v4275_v48 = vadd.f32 %v4184_v12, %v2058_v45 }
 0x3d7   :  { %v4270_v47 = vadd.f32 %v3370_v46, %v4184_v12  ;;  %v2061_v2 = vpop.f32.mrb[147].mxu1  ;;  %2189 = vrot.lane.b32.xlu0 %v4267_v44, %s3600_s2 }
 0x3d8   :  { %v4280_v49 = vadd.f32 %v4184_v12, %v2061_v2 }
 0x3d9   :  { %2191 = vrot.lane.b32.xlu1 %v4270_v47, %s3600_s2 }
 0x3db   :  { %2185 = vrot.lane.b32.xlu0 %v4275_v48, %s3600_s2 }
 0x3dd   :  { %2187 = vrot.lane.b32.xlu1 %v4280_v49, %s3600_s2 }
 0x3e4   :  { %v3373_v50 = vpop.f32.mrb[148].mxu1 }
 0x3e5   :  { %v4287_v51 = vadd.f32 %v3373_v50, %v4184_v12  ;;  %v2074_v52 = vpop.f32.mrb[149].mxu1 }
 0x3e6   :  { %v3374_v53 = vpop.f32.mrb[150].mxu1  ;;  %v4295_v56 = vadd.f32 %v4184_v12, %v2074_v52 }
 0x3e7   :  { %v4290_v54 = vadd.f32 %v3374_v53, %v4184_v12  ;;  %v2077_v55 = vpop.f32.mrb[151].mxu1  ;;  %2197 = vrot.lane.b32.xlu0 %v4287_v51, %s3600_s2 }
 0x3e8   :  { %v4300_v57 = vadd.f32 %v4184_v12, %v2077_v55 }
 0x3e9   :  { %2199 = vrot.lane.b32.xlu1 %v4290_v54, %s3600_s2 }
 0x3eb   :  { %2193 = vrot.lane.b32.xlu0 %v4295_v56, %s3600_s2 }
 0x3ed   :  { %2195 = vrot.lane.b32.xlu1 %v4300_v57, %s3600_s2 }
 0x3f4   :  { %v3377_v58 = vpop.f32.mrb[152].mxu1 }
 0x3f5   :  { %v4307_v59 = vadd.f32 %v3377_v58, %v4184_v12  ;;  %v2090_v60 = vpop.f32.mrb[153].mxu1 }
 0x3f6   :  { %v3378_v61 = vpop.f32.mrb[154].mxu1  ;;  %v4315_v3 = vadd.f32 %v4184_v12, %v2090_v60 }
 0x3f7   :  { %v4310_v62 = vadd.f32 %v3378_v61, %v4184_v12  ;;  %v2093_v63 = vpop.f32.mrb[155].mxu1  ;;  %2205 = vrot.lane.b32.xlu0 %v4307_v59, %s3600_s2 }
 0x3f8   :  { %v4320_v5 = vadd.f32 %v4184_v12, %v2093_v63 }
 0x3f9   :  { %2207 = vrot.lane.b32.xlu1 %v4310_v62, %s3600_s2 }
 0x3fb   :  { %2201 = vrot.lane.b32.xlu0 %v4315_v3, %s3600_s2 }
 0x3fd   :  { %2203 = vrot.lane.b32.xlu1 %v4320_v5, %s3600_s2 }
 0x404   :  { %v3381_v6 = vpop.f32.mrb[156].mxu1 }
 0x405   :  { %v4327_v7 = vadd.f32 %v3381_v6, %v4184_v12  ;;  %v2106_v8 = vpop.f32.mrb[157].mxu1 }
 0x406   :  { %v3382_v9 = vpop.f32.mrb[158].mxu1  ;;  %v4335_v13 = vadd.f32 %v4184_v12, %v2106_v8 }
 0x407   :  { %v4330_v10 = vadd.f32 %v3382_v9, %v4184_v12  ;;  %v2109_v11 = vpop.f32.mrb[159].mxu1  ;;  %2213 = vrot.lane.b32.xlu0 %v4327_v7, %s3600_s2 }
 0x408   :  { %v4341_v37 = vadd.f32 %v4184_v12, %v2109_v11 }
 0x409   :  { %v2158_v15 = vpop.permute.xlu1 %2157  ;;  %2215 = vrot.lane.b32.xlu1 %v4330_v10, %s3600_s2 }
 0x40a   :  { %v2251_v16 = vsub.f32 %v4187_v14, %v2158_v15  ;;  %v2154_v17 = vpop.permute.xlu0 %2153 }
 0x40b   :  { %v2249_v38 = vsub.f32 %v4190_v40, %v2154_v17  ;;  %2209 = vrot.lane.b32.xlu0 %v4335_v13, %s3600_s2 }
 0x40c   :  { %v2285_v39 = vmul.f32 1.442695, %v2251_v16 }
 0x40d   :  { %v2281_v23 = vmul.f32 1.442695, %v2249_v38  ;;  %v2160_v26 = vpop.permute.xlu1 %2159  ;;  %2211 = vrot.lane.b32.xlu1 %v4341_v37, %s3600_s2 }
 0x40e   :  { %3444 = vpow2.f32 %v2285_v39  ;;  %v2252_v27 = vsub.f32 %v4197_v18, %v2160_v26  ;;  %v2156_v28 = vpop.permute.xlu0 %2155 }
 0x40f   :  { %3446 = vpow2.f32 %v2281_v23  ;;  %v2250_v14 = vsub.f32 %v4200_v19, %v2156_v28 }
 0x410   :  { %v2287_v12 = vmul.f32 1.442695, %v2252_v27 }
 0x411   :  { %v2283_v30 = vmul.f32 1.442695, %v2250_v14 }
 0x412   :  { %3448 = vpow2.f32 %v2287_v12 }
 0x413   :  { %3450 = vpow2.f32 %v2283_v30 }
 0x418   :  { %v3445_v40 = vpop.eup %3444 }
 0x419   :  { %v3447_v33 = vpop.eup %3446  ;;  %v2347_v35 = vadd.f32 1.0, %v3445_v40  ;;  %v2166_v1 = vpop.permute.xlu0 %2165 }
 0x41a   :  { %v2345_v41 = vadd.f32 1.0, %v3447_v33  ;;  %v2255_v43 = vsub.f32 %v4207_v20, %v2166_v1 }
 0x41b   :  { %3452 = vrcp.f32 %v2347_v35  ;;  %v2168_v45 = vpop.permute.xlu1 %2167 }
 0x41c   :  { %v3449_v46 = vpop.eup %3448  ;;  %v2293_v2 = vmul.f32 1.442695, %v2255_v43  ;;  %v2256_v18 = vsub.f32 %v4210_v22, %v2168_v45  ;;  %3454 = vrcp.f32 %v2345_v41 }
 0x41d   :  { %v3451_v50 = vpop.eup %3450  ;;  %v2348_v19 = vadd.f32 1.0, %v3449_v46  ;;  %v2162_v52 = vpop.permute.xlu0 %2161 }
 0x41e   :  { %3456 = vpow2.f32 %v2293_v2  ;;  %v2295_v53 = vmul.f32 1.442695, %v2256_v18  ;;  %v2253_v55 = vsub.f32 %v4215_v24, %v2162_v52  ;;  %v2346_v58 = vadd.f32 1.0, %v3451_v50 }
 0x41f   :  { %3458 = vrcp.f32 %v2348_v19  ;;  %v2164_v60 = vpop.permute.xlu1 %2163 }
 0x420   :  { %v2289_v61 = vmul.f32 1.442695, %v2253_v55  ;;  %v2254_v20 = vsub.f32 %v4220_v25, %v2164_v60  ;;  %3460 = vpow2.f32 %v2295_v53 }
 0x422   :  { %3462 = vpow2.f32 %v2289_v61  ;;  %v2291_v63 = vmul.f32 1.442695, %v2254_v20 }
 0x423   :  { %3464 = vrcp.f32 %v2346_v58 }
 0x424   :  { %3466 = vpow2.f32 %v2291_v63 }
 0x425   :  { %v3453_v22 = vpop.eup %3452 }
 0x426   :  { %2648 = vperm.xlu1 %3388, %v3453_v22   ;;  %v3455_v6 = vpop.eup %3454  ;;  %v2443_v25 = vsub.f32 1.0, %v3453_v22 }
 0x427   :  { %v2441_v27 = vsub.f32 1.0, %v3455_v6 }
 0x428   :  { %v3457_v8 = vpop.eup %3456 }
 0x429   :  { %v3459_v9 = vpop.eup %3458  ;;  %v2351_v11 = vadd.f32 1.0, %v3457_v8  ;;  %v2174_v15 = vpop.permute.xlu0 %2173 }
 0x42a   :  { %v2259_v24 = vsub.f32 %v4227_v21, %v2174_v15  ;;  %2653 = vperm.xlu0 %3389, %v3459_v9   ;;  %2638 = vperm.xlu1 %3388, %v3455_v6   ;;  %v3461_v16 = vpop.eup %3460  ;;  %v2444_v45 = vsub.f32 1.0, %v3459_v9 }
 0x42b   :  { %3468 = vrcp.f32 %v2351_v11  ;;  %v2176_v17 = vpop.permute.xlu1 %2175  ;;  %v2352_v39 = vadd.f32 1.0, %v3461_v16 }
 0x42c   :  { %v3463_v38 = vpop.eup %3462  ;;  %v2301_v23 = vmul.f32 1.442695, %v2259_v24  ;;  %v2260_v26 = vsub.f32 %v4230_v29, %v2176_v17 }
 0x42d   :  { %v3465_v28 = vpop.eup %3464  ;;  %v2349_v14 = vadd.f32 1.0, %v3463_v38  ;;  %v2170_v12 = vpop.permute.xlu0 %2169  ;;  %3470 = vrcp.f32 %v2352_v39 }
 0x42e   :  { %v3467_v30 = vpop.eup %3466  ;;  %v2303_v40 = vmul.f32 1.442695, %v2260_v26  ;;  %v2257_v21 = vsub.f32 %v4235_v31, %v2170_v12  ;;  %2488 = vperm.xlu1 %3388, %v2443_v25   ;;  %2478 = vperm.xlu0 %3389, %v2441_v27   ;;  %v2442_v43 = vsub.f32 1.0, %v3465_v28 }
 0x42f   :  { %3472 = vrcp.f32 %v2349_v14  ;;  %v2350_v33 = vadd.f32 1.0, %v3467_v30  ;;  %v2172_v35 = vpop.permute.xlu1 %2171 }
 0x430   :  { %3474 = vpow2.f32 %v2301_v23  ;;  %v2297_v1 = vmul.f32 1.442695, %v2257_v21  ;;  %v2258_v41 = vsub.f32 %v4240_v32, %v2172_v35 }
 0x431   :  { %3476 = vrcp.f32 %v2350_v33 }
 0x432   :  { %3478 = vpow2.f32 %v2303_v40  ;;  %v2299_v29 = vmul.f32 1.442695, %v2258_v41  ;;  %2643 = vperm.xlu0 %3389, %v3465_v28   ;;  %2483 = vperm.xlu1 %3388, %v2442_v43  }
 0x433   :  { %3480 = vpow2.f32 %v2297_v1 }
 0x434   :  { %3482 = vpow2.f32 %v2299_v29 }
 0x435   :  { %v3469_v46 = vpop.eup %3468 }
 0x436   :  { %2493 = vperm.xlu0 %3389, %v2444_v45   ;;  %2668 = vperm.xlu1 %3388, %v3469_v46   ;;  %v2447_v61 = vsub.f32 1.0, %v3469_v46 }
 0x437   :  { %v3471_v31 = vpop.eup %3470 }
 0x438   :  { %v2448_v24 = vsub.f32 1.0, %v3471_v31 }
 0x439   :  { %v3473_v2 = vpop.eup %3472  ;;  %v2182_v18 = vpop.permute.xlu0 %2181 }
 0x43a   :  { %v3475_v50 = vpop.eup %3474  ;;  %v2263_v19 = vsub.f32 %v4247_v34, %v2182_v18  ;;  %2673 = vperm.xlu0 %3389, %v3471_v31   ;;  %2658 = vperm.xlu1 %3388, %v3473_v2   ;;  %v2445_v17 = vsub.f32 1.0, %v3473_v2 }
 0x43b   :  { %v3477_v32 = vpop.eup %3476  ;;  %v2355_v52 = vadd.f32 1.0, %v3475_v50  ;;  %v2184_v53 = vpop.permute.xlu1 %2183 }
 0x43c   :  { %v3479_v55 = vpop.eup %3478  ;;  %v2309_v58 = vmul.f32 1.442695, %v2263_v19  ;;  %v2264_v60 = vsub.f32 %v4250_v36, %v2184_v53  ;;  %v2446_v38 = vsub.f32 1.0, %v3477_v32 }
 0x43d   :  { %v3481_v20 = vpop.eup %3480  ;;  %3484 = vrcp.f32 %v2355_v52  ;;  %v2356_v63 = vadd.f32 1.0, %v3479_v55  ;;  %v2178_v22 = vpop.permute.xlu0 %2177 }
 0x43e   :  { %v3483_v6 = vpop.eup %3482  ;;  %v2353_v8 = vadd.f32 1.0, %v3481_v20  ;;  %3486 = vpow2.f32 %v2309_v58  ;;  %v2311_v9 = vmul.f32 1.442695, %v2264_v60  ;;  %v2261_v34 = vsub.f32 %v4255_v42, %v2178_v22  ;;  %2663 = vperm.xlu0 %3389, %v3477_v32   ;;  %2508 = vperm.xlu1 %3388, %v2447_v61  }
 0x43f   :  { %3488 = vrcp.f32 %v2356_v63  ;;  %v2354_v11 = vadd.f32 1.0, %v3483_v6  ;;  %v2180_v15 = vpop.permute.xlu1 %2179 }
 0x440   :  { %3490 = vrcp.f32 %v2353_v8  ;;  %v2305_v16 = vmul.f32 1.442695, %v2261_v34  ;;  %v2262_v36 = vsub.f32 %v4260_v4, %v2180_v15 }
 0x441   :  { %3492 = vrcp.f32 %v2354_v11 }
 0x442   :  { %3494 = vpow2.f32 %v2311_v9  ;;  %v2307_v25 = vmul.f32 1.442695, %v2262_v36  ;;  %2513 = vperm.xlu0 %3389, %v2448_v24   ;;  %2498 = vperm.xlu1 %3388, %v2445_v17  }
 0x443   :  { %3496 = vpow2.f32 %v2305_v16 }
 0x444   :  { %3498 = vpow2.f32 %v2307_v25 }
 0x446   :  { %2503 = vperm.xlu0 %3389, %v2446_v38  }
 0x447   :  { %v3485_v42 = vpop.eup %3484 }
 0x448   :  { %v3487_v39 = vpop.eup %3486  ;;  %2688 = vperm.xlu1 %3388, %v3485_v42   ;;  %v2451_v41 = vsub.f32 1.0, %v3485_v42 }
 0x449   :  { %v3489_v23 = vpop.eup %3488  ;;  %v2359_v26 = vadd.f32 1.0, %v3487_v39  ;;  %v2190_v27 = vpop.permute.xlu0 %2189 }
 0x44a   :  { %v3491_v28 = vpop.eup %3490  ;;  %v2267_v14 = vsub.f32 %v4267_v44, %v2190_v27  ;;  %2693 = vperm.xlu0 %3389, %v3489_v23  }
 0x44b   :  { %v3493_v4 = vpop.eup %3492  ;;  %3500 = vrcp.f32 %v2359_v26  ;;  %v2192_v12 = vpop.permute.xlu1 %2191  ;;  %v2449_v19 = vsub.f32 1.0, %v3491_v28 }
 0x44c   :  { %v3495_v30 = vpop.eup %3494  ;;  %v2317_v40 = vmul.f32 1.442695, %v2267_v14  ;;  %2678 = vperm.xlu1 %3388, %v3491_v28   ;;  %v2268_v21 = vsub.f32 %v4270_v47, %v2192_v12  ;;  %v2452_v47 = vsub.f32 1.0, %v3489_v23  ;;  %v2450_v32 = vsub.f32 1.0, %v3493_v4 }
 0x44d   :  { %v3497_v33 = vpop.eup %3496  ;;  %v2360_v35 = vadd.f32 1.0, %v3495_v30  ;;  %v2186_v1 = vpop.permute.xlu0 %2185 }
 0x44e   :  { %v3499_v43 = vpop.eup %3498  ;;  %v2357_v29 = vadd.f32 1.0, %v3497_v33  ;;  %3502 = vpow2.f32 %v2317_v40  ;;  %v2319_v45 = vmul.f32 1.442695, %v2268_v21  ;;  %v2265_v46 = vsub.f32 %v4275_v48, %v2186_v1  ;;  %2683 = vperm.xlu0 %3389, %v3493_v4  }
 0x44f   :  { %3504 = vrcp.f32 %v2360_v35  ;;  %v2358_v44 = vadd.f32 1.0, %v3499_v43  ;;  %v2188_v31 = vpop.permute.xlu1 %2187 }
 0x450   :  { %3506 = vrcp.f32 %v2357_v29  ;;  %v2313_v2 = vmul.f32 1.442695, %v2265_v46  ;;  %2528 = vperm.xlu1 %3388, %v2451_v41   ;;  %v2266_v18 = vsub.f32 %v4280_v49, %v2188_v31 }
 0x451   :  { %3508 = vrcp.f32 %v2358_v44 }
 0x452   :  { %3510 = vpow2.f32 %v2319_v45  ;;  %v2315_v50 = vmul.f32 1.442695, %v2266_v18  ;;  %2533 = vperm.xlu0 %3389, %v2452_v47  }
 0x453   :  { %3512 = vpow2.f32 %v2313_v2 }
 0x454   :  { %3514 = vpow2.f32 %v2315_v50  ;;  %2518 = vperm.xlu1 %3388, %v2449_v19  }
 0x455   :  { %v3501_v48 = vpop.eup %3500 }
 0x456   :  { %2523 = vperm.xlu0 %3389, %v2450_v32   ;;  %v2455_v11 = vsub.f32 1.0, %v3501_v48 }
 0x458   :  { %v3503_v52 = vpop.eup %3502  ;;  %2708 = vperm.xlu1 %3388, %v3501_v48  }
 0x459   :  { %v3505_v53 = vpop.eup %3504  ;;  %v2363_v55 = vadd.f32 1.0, %v3503_v52  ;;  %v2198_v58 = vpop.permute.xlu0 %2197 }
 0x45a   :  { %v3507_v60 = vpop.eup %3506  ;;  %v2271_v49 = vsub.f32 %v4287_v51, %v2198_v58  ;;  %2713 = vperm.xlu0 %3389, %v3505_v53  }
 0x45b   :  { %v3509_v61 = vpop.eup %3508  ;;  %3516 = vrcp.f32 %v2363_v55  ;;  %v2200_v20 = vpop.permute.xlu1 %2199  ;;  %v2453_v39 = vsub.f32 1.0, %v3507_v60 }
 0x45c   :  { %v3511_v63 = vpop.eup %3510  ;;  %v2325_v22 = vmul.f32 1.442695, %v2271_v49  ;;  %2698 = vperm.xlu1 %3388, %v3507_v60   ;;  %v2272_v6 = vsub.f32 %v4290_v54, %v2200_v20  ;;  %v2456_v54 = vsub.f32 1.0, %v3505_v53  ;;  %v2454_v23 = vsub.f32 1.0, %v3509_v61 }
 0x45d   :  { %v3513_v8 = vpop.eup %3512  ;;  %v2364_v9 = vadd.f32 1.0, %v3511_v63  ;;  %v2194_v34 = vpop.permute.xlu0 %2193 }
 0x45e   :  { %v3515_v15 = vpop.eup %3514  ;;  %v2361_v24 = vadd.f32 1.0, %v3513_v8  ;;  %3518 = vpow2.f32 %v2325_v22  ;;  %v2327_v16 = vmul.f32 1.442695, %v2272_v6  ;;  %v2269_v36 = vsub.f32 %v4295_v56, %v2194_v34  ;;  %2703 = vperm.xlu0 %3389, %v3509_v61  }
 0x45f   :  { %3520 = vrcp.f32 %v2364_v9  ;;  %v2362_v51 = vadd.f32 1.0, %v3515_v15  ;;  %v2196_v17 = vpop.permute.xlu1 %2195 }
 0x460   :  { %3522 = vrcp.f32 %v2361_v24  ;;  %v2321_v25 = vmul.f32 1.442695, %v2269_v36  ;;  %2548 = vperm.xlu1 %3388, %v2455_v11   ;;  %v2270_v38 = vsub.f32 %v4300_v57, %v2196_v17 }
 0x461   :  { %3524 = vrcp.f32 %v2362_v51 }
 0x462   :  { %3526 = vpow2.f32 %v2327_v16  ;;  %v2323_v42 = vmul.f32 1.442695, %v2270_v38  ;;  %2553 = vperm.xlu0 %3389, %v2456_v54  }
 0x463   :  { %3528 = vpow2.f32 %v2321_v25 }
 0x464   :  { %3530 = vpow2.f32 %v2323_v42  ;;  %2538 = vperm.xlu1 %3388, %v2453_v39  }
 0x465   :  { %v3517_v56 = vpop.eup %3516 }
 0x466   :  { %2543 = vperm.xlu0 %3389, %v2454_v23   ;;  %v2459_v43 = vsub.f32 1.0, %v3517_v56 }
 0x468   :  { %v3519_v26 = vpop.eup %3518  ;;  %2728 = vperm.xlu1 %3388, %v3517_v56  }
 0x469   :  { %v3521_v27 = vpop.eup %3520  ;;  %v2367_v28 = vadd.f32 1.0, %v3519_v26  ;;  %v2206_v14 = vpop.permute.xlu0 %2205 }
 0x46a   :  { %v3523_v4 = vpop.eup %3522  ;;  %v2275_v57 = vsub.f32 %v4307_v59, %v2206_v14  ;;  %2733 = vperm.xlu0 %3389, %v3521_v27  }
 0x46b   :  { %v3525_v12 = vpop.eup %3524  ;;  %3532 = vrcp.f32 %v2367_v28  ;;  %v2208_v30 = vpop.permute.xlu1 %2207  ;;  %v2457_v50 = vsub.f32 1.0, %v3523_v4 }
 0x46c   :  { %v3527_v40 = vpop.eup %3526  ;;  %v2333_v21 = vmul.f32 1.442695, %v2275_v57  ;;  %2718 = vperm.xlu1 %3388, %v3523_v4   ;;  %v2276_v33 = vsub.f32 %v4310_v62, %v2208_v30  ;;  %v2460_v62 = vsub.f32 1.0, %v3521_v27  ;;  %v2458_v19 = vsub.f32 1.0, %v3525_v12 }
 0x46d   :  { %v3529_v35 = vpop.eup %3528  ;;  %v2368_v1 = vadd.f32 1.0, %v3527_v40  ;;  %v2202_v41 = vpop.permute.xlu0 %2201 }
 0x46e   :  { %v3531_v29 = vpop.eup %3530  ;;  %v2365_v45 = vadd.f32 1.0, %v3529_v35  ;;  %3534 = vpow2.f32 %v2333_v21  ;;  %v2335_v46 = vmul.f32 1.442695, %v2276_v33  ;;  %v2273_v44 = vsub.f32 %v4315_v3, %v2202_v41  ;;  %2723 = vperm.xlu0 %3389, %v3525_v12  }
 0x46f   :  { %3536 = vrcp.f32 %v2368_v1  ;;  %v2366_v59 = vadd.f32 1.0, %v3531_v29  ;;  %v2204_v31 = vpop.permute.xlu1 %2203 }
 0x470   :  { %3538 = vrcp.f32 %v2365_v45  ;;  %v2329_v2 = vmul.f32 1.442695, %v2273_v44  ;;  %2568 = vperm.xlu1 %3388, %v2459_v43   ;;  %v2274_v18 = vsub.f32 %v4320_v5, %v2204_v31 }
 0x471   :  { %3540 = vrcp.f32 %v2366_v59 }
 0x472   :  { %3542 = vpow2.f32 %v2335_v46  ;;  %v2331_v47 = vmul.f32 1.442695, %v2274_v18  ;;  %2573 = vperm.xlu0 %3389, %v2460_v62   ;;  %v2474_v46 = vand.u32 127, %v49_v0 }
 0x473   :  { %3544 = vpow2.f32 %v2329_v2 }
 0x474   :  { %3546 = vpow2.f32 %v2331_v47  ;;  %2558 = vperm.xlu1 %3388, %v2457_v50   ;;  %vm2475_vm3 = vcmp.eq.s32.totalorder %v2474_v46, 0 }
 0x475   :  { %v3533_v3 = vpop.eup %3532 }
 0x476   :  { %2563 = vperm.xlu0 %3389, %v2458_v19   ;;  %v2463_v8 = vsub.f32 1.0, %v3533_v3 }
 0x478   :  { %v3535_v32 = vpop.eup %3534  ;;  %2748 = vperm.xlu1 %3388, %v3533_v3  }
 0x479   :  { %v3537_v48 = vpop.eup %3536  ;;  %v2371_v52 = vadd.f32 1.0, %v3535_v32  ;;  %v2214_v53 = vpop.permute.xlu0 %2213 }
 0x47a   :  { %v3539_v55 = vpop.eup %3538  ;;  %v2279_v5 = vsub.f32 %v4327_v7, %v2214_v53  ;;  %2753 = vperm.xlu0 %3389, %v3537_v48  }
 0x47b   :  { %v3541_v58 = vpop.eup %3540  ;;  %3548 = vrcp.f32 %v2371_v52  ;;  %v2216_v60 = vpop.permute.xlu1 %2215  ;;  %v2461_v17 = vsub.f32 1.0, %v3539_v55 }
 0x47c   :  { %v3543_v49 = vpop.eup %3542  ;;  %v2341_v61 = vmul.f32 1.442695, %v2279_v5  ;;  %2738 = vperm.xlu1 %3388, %v3539_v55   ;;  %v2280_v20 = vsub.f32 %v4330_v10, %v2216_v60  ;;  %v2464_v10 = vsub.f32 1.0, %v3537_v48  ;;  %v2462_v25 = vsub.f32 1.0, %v3541_v58 }
 0x47d   :  { %v3545_v63 = vpop.eup %3544  ;;  %v2372_v22 = vadd.f32 1.0, %v3543_v49  ;;  %v2210_v6 = vpop.permute.xlu0 %2209 }
 0x47e   :  { %v3547_v9 = vpop.eup %3546  ;;  %v2369_v34 = vadd.f32 1.0, %v3545_v63  ;;  %3550 = vpow2.f32 %v2341_v61  ;;  %v2343_v11 = vmul.f32 1.442695, %v2280_v20  ;;  %v2277_v15 = vsub.f32 %v4335_v13, %v2210_v6  ;;  %2743 = vperm.xlu0 %3389, %v3541_v58  }
 0x47f   :  { %3552 = vrcp.f32 %v2372_v22  ;;  %v2370_v7 = vadd.f32 1.0, %v3547_v9  ;;  %v2212_v24 = vpop.permute.xlu1 %2211 }
 0x480   :  { %3554 = vrcp.f32 %v2369_v34  ;;  %v2337_v16 = vmul.f32 1.442695, %v2277_v15  ;;  %2588 = vperm.xlu1 %3388, %v2463_v8   ;;  %v2278_v36 = vsub.f32 %v4341_v37, %v2212_v24 }
 0x481   :  { %3556 = vrcp.f32 %v2370_v7 }
 0x482   :  { %3558 = vpow2.f32 %v2343_v11  ;;  %v2339_v51 = vmul.f32 1.442695, %v2278_v36  ;;  %2593 = vperm.xlu0 %3389, %v2464_v10  }
 0x483   :  { %3560 = vpow2.f32 %v2337_v16 }
 0x484   :  { %3562 = vpow2.f32 %v2339_v51  ;;  %2578 = vperm.xlu1 %3388, %v2461_v17  }
 0x485   :  { %v3549_v13 = vpop.eup %3548 }
 0x486   :  { %2583 = vperm.xlu0 %3389, %v2462_v25   ;;  %v2467_v14 = vsub.f32 1.0, %v3549_v13 }
 0x488   :  { %v3551_v38 = vpop.eup %3550  ;;  %2768 = vperm.xlu1 %3388, %v3549_v13  }
 0x489   :  { %v3553_v54 = vpop.eup %3552  ;;  %v2375_v39 = vadd.f32 1.0, %v3551_v38 }
 0x48a   :  { %v3555_v42 = vpop.eup %3554  ;;  %2773 = vperm.xlu0 %3389, %v3553_v54   ;;  %v2468_v57 = vsub.f32 1.0, %v3553_v54 }
 0x48b   :  { %v3557_v23 = vpop.eup %3556  ;;  %3564 = vrcp.f32 %v2375_v39  ;;  %v2465_v12 = vsub.f32 1.0, %v3555_v42 }
 0x48c   :  { %v3559_v37 = vpop.eup %3558  ;;  %2758 = vperm.xlu1 %3388, %v3555_v42   ;;  %v2466_v30 = vsub.f32 1.0, %v3557_v23 }
 0x48d   :  { %v3561_v56 = vpop.eup %3560  ;;  %v2376_v26 = vadd.f32 1.0, %v3559_v37 }
 0x48e   :  { %v3563_v27 = vpop.eup %3562  ;;  %v2373_v28 = vadd.f32 1.0, %v3561_v56  ;;  %2763 = vperm.xlu0 %3389, %v3557_v23  }
 0x48f   :  { %3566 = vrcp.f32 %v2376_v26  ;;  %v2374_v4 = vadd.f32 1.0, %v3563_v27 }
 0x490   :  { %3568 = vrcp.f32 %v2373_v28  ;;  %2608 = vperm.xlu1 %3388, %v2467_v14  }
 0x491   :  { %3570 = vrcp.f32 %v2374_v4 }
 0x492   :  { %2613 = vperm.xlu0 %3389, %v2468_v57  }
 0x494   :  { %2598 = vperm.xlu1 %3388, %v2465_v12  }
 0x495   :  { %v3565_v40 = vpop.eup %3564 }
 0x496   :  { %2603 = vperm.xlu0 %3389, %v2466_v30   ;;  %v2471_v1 = vsub.f32 1.0, %v3565_v40 }
 0x499   :  { %v3567_v21 = vpop.eup %3566 }
 0x49a   :  { %v3569_v33 = vpop.eup %3568  ;;  %v2472_v41 = vsub.f32 1.0, %v3567_v21 }
 0x49b   :  { %v3571_v35 = vpop.eup %3570  ;;  %2778 = vperm.xlu1 %3388, %v3569_v33   ;;  %v2469_v43 = vsub.f32 1.0, %v3569_v33 }
 0x49c   :  { %2783 = vperm.xlu0 %3389, %v3571_v35   ;;  %v2470_v29 = vsub.f32 1.0, %v3571_v35 }
 0x49f   :  { %2628 = vperm.xlu1 %3388, %v2471_v1  }
 0x4a0   :  { %2633 = vperm.xlu0 %3389, %v2472_v41  }
 0x4a3   :  { %2618 = vperm.xlu1 %3388, %v2469_v43  }
 0x4a4   :  { %2623 = vperm.xlu0 %3389, %v2470_v29  }
 0x4a5   :  { %v2649_v45 = vpop.permute.xlu1 %2648 }
 0x4a7   :  { %2788 = vperm.xlu1 %3388, %v3565_v40  }
 0x4a8   :  { %2793 = vperm.xlu0 %3389, %v3567_v21  }
 0x4a9   :  { %v2639_v44 = vpop.permute.xlu1 %2638  ;;  %v2654_v59 = vpop.permute.xlu0 %2653 }
 0x4ad   :  { %v2489_v31 = vpop.permute.xlu1 %2488  ;;  %v2479_v2 = vpop.permute.xlu0 %2478 }
 0x4ae   :  { %v2798_v18 = vsel %vm2475_vm3, %v2489_v31, %v2649_v45  ;;  %v2796_v62 = vsel %vm2475_vm3, %v2479_v2, %v2639_v44 }
 0x4af   :  { %2831 = vst.msk [vmem:[#allocation6 + $0x10] sm:$0xff] %vm2828_vm4, %v2798_v18  ;;  %2829 = vst.msk [vmem:[#allocation6] sm:$0xff] %vm2828_vm4, %v2796_v62 }
 0x4b1   :  { %v2484_v47 = vpop.permute.xlu1 %2483  ;;  %v2644_v50 = vpop.permute.xlu0 %2643 }
 0x4b2   :  { %v2797_v19 = vsel %vm2475_vm3, %v2484_v47, %v2644_v50 }
 0x4b3   :  { %2830 = vst.msk [vmem:[#allocation6 + $0x8] sm:$0xff] %vm2828_vm4, %v2797_v19 }
 0x4b5   :  { %v2669_v0 = vpop.permute.xlu1 %2668  ;;  %v2494_v3 = vpop.permute.xlu0 %2493 }
 0x4b6   :  { %v2906_v32 = vld [vmem:[#allocation6 + $0x10] sm:$0xff]  ;;  %v2902_v48 = vld [vmem:[#allocation6] sm:$0xff]  ;;  %v2799_v52 = vsel %vm2475_vm3, %v2494_v3, %v2654_v59 }
 0x4b7   :  { %2907 = vst [vmem:[%s4424_s10 + $0x10] sm:$0xff] %v2906_v32  ;;  %2903 = vst [vmem:[%s4424_s10] sm:$0xff] %v2902_v48 }
 0x4b8   :  { %2832 = vst.msk [vmem:[#allocation6 + $0x18] sm:$0xff] %vm2828_vm4, %v2799_v52 }
 0x4b9   :  { %v2659_v53 = vpop.permute.xlu1 %2658  ;;  %v2674_v55 = vpop.permute.xlu0 %2673 }
 0x4ba   :  { %v2904_v5 = vld [vmem:[#allocation6 + $0x8] sm:$0xff] }
 0x4bb   :  { %2905 = vst [vmem:[%s4424_s10 + $0x8] sm:$0xff] %v2904_v5 }
 0x4bd   :  { %v2509_v58 = vpop.permute.xlu1 %2508  ;;  %v2664_v60 = vpop.permute.xlu0 %2663 }
 0x4be   :  { %v2802_v61 = vsel %vm2475_vm3, %v2509_v58, %v2669_v0 }
 0x4bf   :  { %v2908_v49 = vld [vmem:[#allocation6 + $0x18] sm:$0xff]  ;;  %2835 = vst.msk [vmem:[#allocation6 + $0x30] sm:$0xff] %vm2828_vm4, %v2802_v61 }
 0x4c0   :  { %2909 = vst [vmem:[%s4424_s10 + $0x18] sm:$0xff] %v2908_v49 }
 0x4c1   :  { %v2499_v20 = vpop.permute.xlu1 %2498  ;;  %v2514_v63 = vpop.permute.xlu0 %2513 }
 0x4c2   :  { %v2800_v22 = vsel %vm2475_vm3, %v2499_v20, %v2659_v53 }
 0x4c3   :  { %2833 = vst.msk [vmem:[#allocation6 + $0x20] sm:$0xff] %vm2828_vm4, %v2800_v22 }
 0x4c5   :  { %v2504_v6 = vpop.permute.xlu0 %2503 }
 0x4c6   :  { %v2914_v8 = vld [vmem:[#allocation6 + $0x30] sm:$0xff]  ;;  %v2801_v9 = vsel %vm2475_vm3, %v2504_v6, %v2664_v60 }
 0x4c7   :  { %2915 = vst [vmem:[%s4424_s10 + $0x30] sm:$0xff] %v2914_v8  ;;  %v2689_v34 = vpop.permute.xlu1 %2688  ;;  %2834 = vst.msk [vmem:[#allocation6 + $0x28] sm:$0xff] %vm2828_vm4, %v2801_v9 }
 0x4c9   :  { %v2694_v11 = vpop.permute.xlu0 %2693 }
 0x4ca   :  { %v2910_v15 = vld [vmem:[#allocation6 + $0x20] sm:$0xff] }
 0x4cb   :  { %2911 = vst [vmem:[%s4424_s10 + $0x20] sm:$0xff] %v2910_v15  ;;  %v2679_v7 = vpop.permute.xlu1 %2678 }
 0x4cd   :  { %v2684_v24 = vpop.permute.xlu0 %2683 }
 0x4ce   :  { %v2912_v16 = vld [vmem:[#allocation6 + $0x28] sm:$0xff] }
 0x4cf   :  { %2913 = vst [vmem:[%s4424_s10 + $0x28] sm:$0xff] %v2912_v16  ;;  %v2529_v36 = vpop.permute.xlu1 %2528 }
 0x4d1   :  { %v2534_v10 = vpop.permute.xlu0 %2533 }
 0x4d3   :  { %v2519_v51 = vpop.permute.xlu1 %2518 }
 0x4d5   :  { %v2524_v17 = vpop.permute.xlu0 %2523 }
 0x4d7   :  { %v2709_v25 = vpop.permute.xlu1 %2708 }
 0x4d9   :  { %v2714_v13 = vpop.permute.xlu0 %2713 }
 0x4db   :  { %v2699_v38 = vpop.permute.xlu1 %2698 }
 0x4dd   :  { %v2704_v54 = vpop.permute.xlu0 %2703 }
 0x4df   :  { %v2549_v42 = vpop.permute.xlu1 %2548 }
 0x4e1   :  { %v2554_v39 = vpop.permute.xlu0 %2553 }
 0x4e3   :  { %v2539_v23 = vpop.permute.xlu1 %2538 }
 0x4e5   :  { %v2544_v37 = vpop.permute.xlu0 %2543 }
 0x4e7   :  { %v2729_v56 = vpop.permute.xlu1 %2728 }
 0x4e9   :  { %v2734_v26 = vpop.permute.xlu0 %2733 }
 0x4eb   :  { %v2719_v27 = vpop.permute.xlu1 %2718 }
 0x4ed   :  { %v2724_v28 = vpop.permute.xlu0 %2723 }
 0x4ef   :  { %v2569_v14 = vpop.permute.xlu1 %2568 }
 0x4f1   :  { %v2574_v4 = vpop.permute.xlu0 %2573 }
 0x4f3   :  { %v2559_v57 = vpop.permute.xlu1 %2558 }
 0x4f5   :  { %v2564_v12 = vpop.permute.xlu0 %2563 }
 0x4f7   :  { %v2749_v30 = vpop.permute.xlu1 %2748 }
 0x4f9   :  { %v2754_v40 = vpop.permute.xlu0 %2753 }
 0x4fb   :  { %v2739_v21 = vpop.permute.xlu1 %2738 }
 0x4fd   :  { %v2744_v33 = vpop.permute.xlu0 %2743 }
 0x4ff   :  { %v2589_v35 = vpop.permute.xlu1 %2588 }
 0x501   :  { %v2594_v1 = vpop.permute.xlu0 %2593 }
 0x503   :  { %v2579_v41 = vpop.permute.xlu1 %2578 }
 0x505   :  { %v2584_v43 = vpop.permute.xlu0 %2583 }
 0x507   :  { %v2769_v29 = vpop.permute.xlu1 %2768 }
 0x509   :  { %v2774_v45 = vpop.permute.xlu0 %2773 }
 0x50b   :  { %v2759_v46 = vpop.permute.xlu1 %2758 }
 0x50d   :  { %v2764_v44 = vpop.permute.xlu0 %2763 }
 0x50f   :  { %v2609_v59 = vpop.permute.xlu1 %2608 }
 0x511   :  { %v2614_v31 = vpop.permute.xlu0 %2613 }
 0x513   :  { %v2599_v2 = vpop.permute.xlu1 %2598 }
 0x515   :  { %v2604_v18 = vpop.permute.xlu0 %2603 }
 0x51a   :  { %v2779_v62 = vpop.permute.xlu1 %2778 }
 0x51b   :  { %v2784_v47 = vpop.permute.xlu0 %2783 }
 0x51e   :  { %v2629_v50 = vpop.permute.xlu1 %2628 }
 0x51f   :  { %v2634_v19 = vpop.permute.xlu0 %2633 }
 0x522   :  { %v2619_v0 = vpop.permute.xlu1 %2618 }
 0x523   :  { %v2624_v3 = vpop.permute.xlu0 %2623 }
 0x526   :  { %v2789_v32 = vpop.permute.xlu1 %2788 }
 0x527   :  { %v2794_v48 = vpop.permute.xlu0 %2793 }
 0x528   :  { %2921 = vsyncpa [#allocation5], 1 }

</bundles_post_ra>
